<compile_context>
chip_gen: v6e
topology: v6e:2x2x1
jax: 0.10.0
libtpu: 0.0.40
codegen_flags: <defaults>
</compile_context>

<pallas_src>
import math

import jax
import jax.numpy as jnp
from jax.experimental import pallas as pl
from jax.experimental.pallas import tpu as pltpu

# ---- small synthetic config (module implies n_layers=3, d_model=256, heads=8;
#      scaled down to keep the example tiny) ----
S = 16            # sequence length
D = 64            # d_model
H = 4             # attention heads
DH = D // H       # head dim
HD = H * DH       # all heads concatenated (== D)
F = 128           # FFN hidden dim
L = 2             # transformer layers
C = 5             # logits channel dim (torch.sum(..., dim=2) runs over this)
V = 64            # vocab size (== D so the embedding fits the D-row weight slab)
EPS = 1e-5
LANE = 128        # every packed segment starts at a multiple of the lane width

assert V == D, "embedding is packed into the D-row weight slab"
assert HD == D, "Wo is packed into the D-row weight slab"
assert HD <= LANE and F <= LANE and D <= LANE

# -- per-layer lane offsets inside the (D, W_LANES) bf16 weight slab --
EMB_OFF = 0                                  # token embedding (V, D), lanes [0,128)
WL_Q, WL_K, WL_V = 0, LANE, 2 * LANE         # Q/sqrt(DH) | K | V, each (D, HD), lane-aligned
WL_O = 3 * LANE                              # Wo (HD, D)
WL_W1 = 4 * LANE                             # FFN up   (D, F)
WL_W2T = 4 * LANE + F                        # FFN down stored transposed (D, F)
LAYER_W = WL_W2T + F                         # lanes per layer block
def WBASE(l): return LANE + l * LAYER_W
W_LANES = LANE + L * LAYER_W

# -- lane offsets inside the (1, VS_LANES) f32 bias/LN/head vector slab --
VL_LN1G, VL_LN1B, VL_B1, VL_B2, VL_LN2G, VL_LN2B = (
    0, LANE, 2 * LANE, 3 * LANE, 4 * LANE, 5 * LANE)
def VBASE(l): return l * 6 * LANE
WHS_OFF = L * 6 * LANE                       # head weights pre-summed over C -> (D,)
BHS_OFF = WHS_OFF + D                        # head bias pre-summed over C -> scalar
VS_LANES = WHS_OFF + LANE


def _layernorm(x, g, b):
    # single reduction pass: var = E[x^2] - mu^2
    mu = jnp.mean(x, axis=-1, keepdims=True)
    var = jnp.mean(x * x, axis=-1, keepdims=True) - mu * mu
    return (x - mu) * jax.lax.rsqrt(var + EPS) * g + b


# --------------------------------------------------------------------------- #
# Pallas kernel: one full forward per grid step; weights stay VMEM resident.
# --------------------------------------------------------------------------- #
def model_kernel(idx_ref, ids_ref, w_ref, pos_ref, vec_ref, out_ref):
    # ---- embedding lookup as a one-hot MXU matmul + f32 positional emb ----
    ids = ids_ref[0]                                                  # (S,1) i32
    cols = jax.lax.broadcasted_iota(jnp.int32, (S, V), 1)
    onehot = jnp.where(ids == cols, 1.0, 0.0).astype(jnp.bfloat16)    # (S,V)
    emb = w_ref[:, EMB_OFF:EMB_OFF + D]                               # (V,D) bf16
    h = jnp.dot(onehot, emb, preferred_element_type=jnp.float32) + pos_ref[...]

    for l in range(L):                       # static unroll over layers
        wb, vb = WBASE(l), VBASE(l)
        ln1g = vec_ref[:, vb + VL_LN1G: vb + VL_LN1G + D]
        ln1b = vec_ref[:, vb + VL_LN1B: vb + VL_LN1B + D]
        b1   = vec_ref[:, vb + VL_B1:   vb + VL_B1 + F]
        b2   = vec_ref[:, vb + VL_B2:   vb + VL_B2 + D]
        ln2g = vec_ref[:, vb + VL_LN2G: vb + VL_LN2G + D]
        ln2b = vec_ref[:, vb + VL_LN2B: vb + VL_LN2B + D]

        # ---- multi-head self-attention ----
        xb = h.astype(jnp.bfloat16)
        wqkv = w_ref[:, wb + WL_Q: wb + WL_Q + 3 * LANE]              # (D, 384) bf16
        qkv = jnp.dot(xb, wqkv, preferred_element_type=jnp.float32)   # (S, 384) f32
        # lanes [0,HD)=Q (scale folded), [128,128+HD)=K, [256,256+HD)=V

        ctx_parts = []
        for hh in range(H):                  # scores/context are inherently per-head
            qh = qkv[:, WL_Q + hh * DH: WL_Q + (hh + 1) * DH].astype(jnp.bfloat16)
            kh = qkv[:, WL_K + hh * DH: WL_K + (hh + 1) * DH].astype(jnp.bfloat16)
            vh = qkv[:, WL_V + hh * DH: WL_V + (hh + 1) * DH].astype(jnp.bfloat16)
            # scores: contraction on the last dims of both operands (no K transpose)
            s = jax.lax.dot_general(qh, kh, (((1,), (1,)), ((), ())),
                                    preferred_element_type=jnp.float32)   # (S,S)
            s = s - jnp.max(s, axis=-1, keepdims=True)
            p = jnp.exp(s)
            p = p * pl.reciprocal(jnp.sum(p, axis=-1, keepdims=True), approx=True)
            ctx_parts.append(jnp.dot(p.astype(jnp.bfloat16), vh,
                                     preferred_element_type=jnp.float32)) # (S,DH)
        ctx = jnp.concatenate(ctx_parts, axis=1).astype(jnp.bfloat16)     # (S, HD)

        wo = w_ref[:, wb + WL_O: wb + WL_O + D]                           # (HD, D) bf16
        attn = jnp.dot(ctx, wo, preferred_element_type=jnp.float32)       # (S, D)
        h = _layernorm(h + attn, ln1g, ln1b)        # post-LN (XLNet style)

        # ---- position-wise feed-forward ----
        w1  = w_ref[:, wb + WL_W1:  wb + WL_W1 + F]                       # (D,F) bf16
        w2T = w_ref[:, wb + WL_W2T: wb + WL_W2T + F]                      # (D,F) bf16
        u = jnp.dot(h.astype(jnp.bfloat16), w1,
                    preferred_element_type=jnp.float32) + b1              # (S,F)
        u = jax.nn.gelu(u, approximate=True)
        ff = jax.lax.dot_general(u.astype(jnp.bfloat16), w2T,
                                 dimension_numbers=(((1,), (1,)), ((), ())),
                                 preferred_element_type=jnp.float32) + b2
        h = _layernorm(h + ff, ln2g, ln2b)

    # ---- head folded at pack time: sum_c(h @ Wh + bh) == h @ sum_c Wh + sum_c bh ----
    whs = vec_ref[:, WHS_OFF:WHS_OFF + D]                                 # (1,D) f32
    bhs = vec_ref[:, BHS_OFF:BHS_OFF + 1]                                 # (1,1) f32
    pred_fin = jnp.sum(h * whs, axis=-1, keepdims=True)                   # (S,1)

    # ---- pred_fin[index_val] for this grid step, via mask-and-sum ----
    idx = idx_ref[pl.program_id(0)]
    row = jax.lax.broadcasted_iota(jnp.int32, (S, 1), 0)
    sel = jnp.sum(jnp.where(row == idx, pred_fin, 0.0),
                  axis=0, keepdims=True) + bhs                            # (1,1)
    out_ref[0] = sel


# --------------------------------------------------------------------------- #
# Parameter construction & packing
# --------------------------------------------------------------------------- #
def build_params(key):
    ks = jax.random.split(key, 16)
    init = lambda k, shape, sc=0.02: (sc * jax.random.normal(k, shape)).astype(jnp.float32)
    return dict(
        emb=init(ks[0], (V, D)),
        pos=init(ks[1], (S, D)),
        wq=init(ks[2], (L, H, D, DH)),
        wk=init(ks[3], (L, H, D, DH)),
        wv=init(ks[4], (L, H, D, DH)),
        wo=init(ks[5], (L, H, DH, D)),
        w1=init(ks[6], (L, D, F)),
        b1=init(ks[7], (L, F)),
        w2=init(ks[8], (L, F, D)),
        b2=init(ks[9], (L, D)),
        ln1g=1.0 + init(ks[10], (L, D)), ln1b=init(ks[11], (L, D)),
        ln2g=1.0 + init(ks[12], (L, D)), ln2b=init(ks[13], (L, D)),
        wh=init(ks[14], (D, C)),
        bh=init(ks[15], (C,)),
    )


def pack_params(raw):
    scale = 1.0 / math.sqrt(DH)

    # D-row bf16 weight slab: emb | per-layer [Q|K|V|Wo|W1|W2T], lane-aligned segments
    fw = jnp.zeros((D, W_LANES), jnp.float32)
    fw = fw.at[:, EMB_OFF:EMB_OFF + D].set(raw["emb"])
    for l in range(L):
        wb = WBASE(l)
        wq = jnp.transpose(raw["wq"][l], (1, 0, 2)).reshape(D, HD) * scale
        wk = jnp.transpose(raw["wk"][l], (1, 0, 2)).reshape(D, HD)
        wv = jnp.transpose(raw["wv"][l], (1, 0, 2)).reshape(D, HD)
        wo = raw["wo"][l].reshape(HD, D)
        fw = fw.at[:, wb + WL_Q:  wb + WL_Q + HD].set(wq)
        fw = fw.at[:, wb + WL_K:  wb + WL_K + HD].set(wk)
        fw = fw.at[:, wb + WL_V:  wb + WL_V + HD].set(wv)
        fw = fw.at[:, wb + WL_O:  wb + WL_O + D].set(wo)
        fw = fw.at[:, wb + WL_W1: wb + WL_W1 + F].set(raw["w1"][l])
        fw = fw.at[:, wb + WL_W2T:wb + WL_W2T + F].set(raw["w2"][l].T)
    w_slab = fw.astype(jnp.bfloat16)

    # f32 vector slab: per-layer LN/bias rows + pre-summed head weights/bias
    vs = jnp.zeros((1, VS_LANES), jnp.float32)
    for l in range(L):
        vb = VBASE(l)
        vs = vs.at[0, vb + VL_LN1G: vb + VL_LN1G + D].set(raw["ln1g"][l])
        vs = vs.at[0, vb + VL_LN1B: vb + VL_LN1B + D].set(raw["ln1b"][l])
        vs = vs.at[0, vb + VL_B1:   vb + VL_B1 + F].set(raw["b1"][l])
        vs = vs.at[0, vb + VL_B2:   vb + VL_B2 + D].set(raw["b2"][l])
        vs = vs.at[0, vb + VL_LN2G: vb + VL_LN2G + D].set(raw["ln2g"][l])
        vs = vs.at[0, vb + VL_LN2B: vb + VL_LN2B + D].set(raw["ln2b"][l])
    vs = vs.at[0, WHS_OFF:WHS_OFF + D].set(jnp.sum(raw["wh"], axis=1))
    vs = vs.at[0, BHS_OFF].set(jnp.sum(raw["bh"]))

    return {"w_slab": w_slab, "v_slab": vs, "pos": raw["pos"]}


# --------------------------------------------------------------------------- #
# Wrappers
# --------------------------------------------------------------------------- #
def model_finalexpLIG_forward_batched(packed, ids_batch, index_vals):
    """Batched entry point: ids_batch (B,S) int32, index_vals (B,) int32 -> (B,)."""
    B = ids_batch.shape[0]
    ids3 = ids_batch.reshape(B, S, 1).astype(jnp.int32)
    idx = jnp.asarray(index_vals, dtype=jnp.int32).reshape(B)

    grid_spec = pltpu.PrefetchScalarGridSpec(
        num_scalar_prefetch=1,                        # index_vals -> SMEM
        grid=(B,),
        in_specs=[
            pl.BlockSpec((1, S, 1), lambda b, idx_ref: (b, 0, 0)),       # ids
            pl.BlockSpec((D, W_LANES), lambda b, idx_ref: (0, 0)),       # weight slab (resident)
            pl.BlockSpec((S, D), lambda b, idx_ref: (0, 0)),             # pos emb (resident)
            pl.BlockSpec((1, VS_LANES), lambda b, idx_ref: (0, 0)),      # vector slab (resident)
        ],
        out_specs=pl.BlockSpec((1, 1, 1), lambda b, idx_ref: (b, 0, 0)),
    )
    out = pl.pallas_call(
        model_kernel,
        out_shape=jax.ShapeDtypeStruct((B, 1, 1), jnp.float32),
        grid_spec=grid_spec,
        compiler_params=pltpu.CompilerParams(dimension_semantics=("parallel",)),
    )(idx, ids3, packed["w_slab"], packed["pos"], packed["v_slab"])
    return out.reshape(B)


def model_finalexpLIG_forward(packed, x_ids, index_val):
    """torch: model_finalexpLIG(x, index_val) -> shape (1,)."""
    out = model_finalexpLIG_forward_batched(
        packed, x_ids.reshape(1, S), jnp.asarray([index_val], jnp.int32))
    return out                                  # (1,) == pred_fin[index_val].unsqueeze(0)


# --------------------------------------------------------------------------- #
# Pure-JAX reference (mirrors kernel math; exact softmax division).
# --------------------------------------------------------------------------- #
def reference_forward(packed, x_ids, index_val):
    w, vs, pos = packed["w_slab"], packed["v_slab"], packed["pos"]
    ids = x_ids.reshape(S, 1).astype(jnp.int32)
    cols = jnp.arange(V, dtype=jnp.int32)[None, :]
    onehot = jnp.where(ids == cols, 1.0, 0.0).astype(jnp.bfloat16)
    h = jnp.dot(onehot, w[:, EMB_OFF:EMB_OFF + D],
                preferred_element_type=jnp.float32) + pos
    for l in range(L):
        wb, vb = WBASE(l), VBASE(l)
        ln1g = vs[:, vb + VL_LN1G: vb + VL_LN1G + D]
        ln1b = vs[:, vb + VL_LN1B: vb + VL_LN1B + D]
        b1   = vs[:, vb + VL_B1:   vb + VL_B1 + F]
        b2   = vs[:, vb + VL_B2:   vb + VL_B2 + D]
        ln2g = vs[:, vb + VL_LN2G: vb + VL_LN2G + D]
        ln2b = vs[:, vb + VL_LN2B: vb + VL_LN2B + D]
        xb = h.astype(jnp.bfloat16)
        qkv = jnp.dot(xb, w[:, wb + WL_Q: wb + WL_Q + 3 * LANE],
                      preferred_element_type=jnp.float32)
        parts = []
        for hh in range(H):
            qh = qkv[:, WL_Q + hh * DH: WL_Q + (hh + 1) * DH].astype(jnp.bfloat16)
            kh = qkv[:, WL_K + hh * DH: WL_K + (hh + 1) * DH].astype(jnp.bfloat16)
            vh = qkv[:, WL_V + hh * DH: WL_V + (hh + 1) * DH].astype(jnp.bfloat16)
            s = jax.lax.dot_general(qh, kh, (((1,), (1,)), ((), ())),
                                    preferred_element_type=jnp.float32)
            s = s - jnp.max(s, axis=-1, keepdims=True)
            p = jnp.exp(s)
            p = p / jnp.sum(p, axis=-1, keepdims=True)
            parts.append(jnp.dot(p.astype(jnp.bfloat16), vh,
                                 preferred_element_type=jnp.float32))
        ctx = jnp.concatenate(parts, axis=1).astype(jnp.bfloat16)
        attn = jnp.dot(ctx, w[:, wb + WL_O: wb + WL_O + D],
                       preferred_element_type=jnp.float32)
        h = _layernorm(h + attn, ln1g, ln1b)
        u = jnp.dot(h.astype(jnp.bfloat16), w[:, wb + WL_W1: wb + WL_W1 + F],
                    preferred_element_type=jnp.float32) + b1
        u = jax.nn.gelu(u, approximate=True)
        ff = jax.lax.dot_general(u.astype(jnp.bfloat16),
                                 w[:, wb + WL_W2T: wb + WL_W2T + F],
                                 dimension_numbers=(((1,), (1,)), ((), ())),
                                 preferred_element_type=jnp.float32) + b2
        h = _layernorm(h + ff, ln2g, ln2b)
    whs = vs[:, WHS_OFF:WHS_OFF + D]
    bhs = vs[0, BHS_OFF]
    pred_fin = jnp.sum(h * whs, axis=-1) + bhs          # (S,)
    return pred_fin[index_val][None]                     # (1,)


if __name__ == "__main__":
    key = jax.random.PRNGKey(0)
    k_param, k_ids = jax.random.split(key)
    raw = build_params(k_param)
    packed = pack_params(raw)

    # ---- single sequence (module semantics) ----
    x_ids = jax.random.randint(k_ids, (S,), 0, V, dtype=jnp.int32)
    index_val = 3
    out = jax.block_until_ready(model_finalexpLIG_forward(packed, x_ids, index_val))
    assert out.shape == (1,), out.shape
    ref = jax.block_until_ready(reference_forward(packed, x_ids, index_val))
    err = float(jnp.max(jnp.abs(out - ref)))
    assert err < 5e-2, f"kernel/reference mismatch: {err}"

    # ---- batched path (e.g. LIG interpolation steps), parallel grid ----
    B = 4
    ids_b = jax.random.randint(jax.random.PRNGKey(2), (B, S), 0, V, dtype=jnp.int32)
    idx_b = jnp.array([0, 3, 7, S - 1], dtype=jnp.int32)
    out_b = jax.block_until_ready(
        model_finalexpLIG_forward_batched(packed, ids_b, idx_b))
    ref_b = jnp.concatenate(
        [reference_forward(packed, ids_b[n], int(idx_b[n])) for n in range(B)])
    err_b = float(jnp.max(jnp.abs(out_b - ref_b)))
    assert err_b < 5e-2, f"batched kernel/reference mismatch: {err_b}"

    print("KERNEL_OK")
</pallas_src>

<mosaic_0001>
module attributes {stable_mosaic.version = 11 : i64} {
  func.func @model_kernel(%arg0: i32, %arg1: memref<1xi32, #tpu.memory_space<smem>>, %arg2: memref<1x16x1xi32, #tpu.memory_space<vmem>>, %arg3: memref<64x1664xbf16, #tpu.memory_space<vmem>>, %arg4: memref<16x64xf32, #tpu.memory_space<vmem>>, %arg5: memref<1x1664xf32, #tpu.memory_space<vmem>>, %arg6: memref<1x1x1xf32, #tpu.memory_space<vmem>>) attributes {dimension_semantics = [#tpu.dimension_semantics<parallel>], iteration_bounds = array<i64: 1>, scalar_prefetch = 1 : i64, scratch_operands = 0 : i64, tpu.core_type = #tpu.core_type<tc>, window_params = [{transform_indices = @transform_0, window_bounds = array<i64: 1, 16, 1>}, {pipeline_mode = #tpu.pipeline_mode<synchronous>, transform_indices = @transform_1, window_bounds = array<i64: 64, 1664>}, {pipeline_mode = #tpu.pipeline_mode<synchronous>, transform_indices = @transform_2, window_bounds = array<i64: 16, 64>}, {pipeline_mode = #tpu.pipeline_mode<synchronous>, transform_indices = @transform_3, window_bounds = array<i64: 1, 1664>}, {transform_indices = @transform_4, window_bounds = array<i64: 1, 1, 1>}]} {
    %c0 = arith.constant 0 : index
    %c0_0 = arith.constant 0 : index
    %c0_1 = arith.constant 0 : index
    %0 = vector.load %arg2[%c0, %c0_0, %c0_1] : memref<1x16x1xi32, #tpu.memory_space<vmem>>, vector<1x16x1xi32>
    %1 = vector.shape_cast %0 : vector<1x16x1xi32> to vector<16x1xi32>
    %2 = tpu.iota {dimensions = array<i32: 1>} : vector<16x64xi32>
    %3 = vector.broadcast %1 : vector<16x1xi32> to vector<16x64xi32>
    %4 = arith.cmpi eq, %3, %2 : vector<16x64xi32>
    %cst = arith.constant 1.000000e+00 : f32
    %cst_2 = arith.constant 0.000000e+00 : f32
    %5 = vector.broadcast %cst : f32 to vector<16x64xf32>
    %6 = vector.broadcast %cst_2 : f32 to vector<16x64xf32>
    %7 = arith.select %4, %5, %6 : vector<16x64xi1>, vector<16x64xf32>
    %8 = arith.truncf %7 : vector<16x64xf32> to vector<16x64xbf16>
    %c0_3 = arith.constant 0 : index
    %c0_4 = arith.constant 0 : index
    %9 = vector.load %arg3[%c0_3, %c0_4] : memref<64x1664xbf16, #tpu.memory_space<vmem>>, vector<64x64xbf16>
    %cst_5 = arith.constant dense<0.000000e+00> : vector<16x64xf32>
    %10 = tpu.matmul %8, %9, %cst_5 {dimension_numbers = #tpu.dot_dimension_numbers<[1], [0], [0], [1], [0, 0, 1, 1], [], []>} : vector<16x64xbf16>, vector<64x64xbf16>, vector<16x64xf32> -> vector<16x64xf32>
    %c0_6 = arith.constant 0 : index
    %c0_7 = arith.constant 0 : index
    %11 = vector.load %arg4[%c0_6, %c0_7] : memref<16x64xf32, #tpu.memory_space<vmem>>, vector<16x64xf32>
    %12 = arith.addf %10, %11 : vector<16x64xf32>
    %c0_8 = arith.constant 0 : index
    %c0_9 = arith.constant 0 : index
    %13 = vector.load %arg5[%c0_8, %c0_9] : memref<1x1664xf32, #tpu.memory_space<vmem>>, vector<1x64xf32>
    %c0_10 = arith.constant 0 : index
    %c128 = arith.constant 128 : index
    %14 = vector.load %arg5[%c0_10, %c128] : memref<1x1664xf32, #tpu.memory_space<vmem>>, vector<1x64xf32>
    %c0_11 = arith.constant 0 : index
    %c256 = arith.constant 256 : index
    %15 = vector.load %arg5[%c0_11, %c256] : memref<1x1664xf32, #tpu.memory_space<vmem>>, vector<1x128xf32>
    %c0_12 = arith.constant 0 : index
    %c384 = arith.constant 384 : index
    %16 = vector.load %arg5[%c0_12, %c384] : memref<1x1664xf32, #tpu.memory_space<vmem>>, vector<1x64xf32>
    %c0_13 = arith.constant 0 : index
    %c512 = arith.constant 512 : index
    %17 = vector.load %arg5[%c0_13, %c512] : memref<1x1664xf32, #tpu.memory_space<vmem>>, vector<1x64xf32>
    %c0_14 = arith.constant 0 : index
    %c640 = arith.constant 640 : index
    %18 = vector.load %arg5[%c0_14, %c640] : memref<1x1664xf32, #tpu.memory_space<vmem>>, vector<1x64xf32>
    %19 = arith.truncf %12 : vector<16x64xf32> to vector<16x64xbf16>
    %c0_15 = arith.constant 0 : index
    %c128_16 = arith.constant 128 : index
    %20 = vector.load %arg3[%c0_15, %c128_16] : memref<64x1664xbf16, #tpu.memory_space<vmem>>, vector<64x384xbf16>
    %cst_17 = arith.constant dense<0.000000e+00> : vector<16x384xf32>
    %21 = tpu.matmul %19, %20, %cst_17 {dimension_numbers = #tpu.dot_dimension_numbers<[1], [0], [0], [1], [0, 0, 1, 1], [], []>} : vector<16x64xbf16>, vector<64x384xbf16>, vector<16x384xf32> -> vector<16x384xf32>
    %22 = vector.extract_strided_slice %21 {offsets = [0, 0], sizes = [16, 16], strides = [1, 1]} : vector<16x384xf32> to vector<16x16xf32>
    %23 = arith.truncf %22 : vector<16x16xf32> to vector<16x16xbf16>
    %24 = vector.extract_strided_slice %21 {offsets = [0, 128], sizes = [16, 16], strides = [1, 1]} : vector<16x384xf32> to vector<16x16xf32>
    %25 = arith.truncf %24 : vector<16x16xf32> to vector<16x16xbf16>
    %26 = vector.extract_strided_slice %21 {offsets = [0, 256], sizes = [16, 16], strides = [1, 1]} : vector<16x384xf32> to vector<16x16xf32>
    %27 = arith.truncf %26 : vector<16x16xf32> to vector<16x16xbf16>
    %cst_18 = arith.constant dense<0.000000e+00> : vector<16x16xf32>
    %28 = tpu.matmul %23, %25, %cst_18 {dimension_numbers = #tpu.dot_dimension_numbers<[1], [1], [0], [0], [0, 0, 1, 0], [], []>} : vector<16x16xbf16>, vector<16x16xbf16>, vector<16x16xf32> -> vector<16x16xf32>
    %cst_19 = arith.constant dense<0xFF800000> : vector<16xf32>
    %29 = vector.multi_reduction <maximumf>, %28, %cst_19 [1] : vector<16x16xf32> to vector<16xf32>
    %30 = vector.shape_cast %29 : vector<16xf32> to vector<16x1xf32>
    %31 = vector.broadcast %30 : vector<16x1xf32> to vector<16x16xf32>
    %32 = arith.subf %28, %31 : vector<16x16xf32>
    %33 = math.exp %32 : vector<16x16xf32>
    %cst_20 = arith.constant dense<0.000000e+00> : vector<16xf32>
    %34 = vector.multi_reduction <add>, %33, %cst_20 [1] : vector<16x16xf32> to vector<16xf32>
    %35 = vector.shape_cast %34 : vector<16xf32> to vector<16x1xf32>
    %36 = tpu.reciprocal %35 {approx = true} : vector<16x1xf32> -> vector<16x1xf32>
    %37 = vector.broadcast %36 : vector<16x1xf32> to vector<16x16xf32>
    %38 = arith.mulf %33, %37 : vector<16x16xf32>
    %39 = arith.truncf %38 : vector<16x16xf32> to vector<16x16xbf16>
    %cst_21 = arith.constant dense<0.000000e+00> : vector<16x16xf32>
    %40 = tpu.matmul %39, %27, %cst_21 {dimension_numbers = #tpu.dot_dimension_numbers<[1], [0], [0], [1], [0, 0, 1, 1], [], []>} : vector<16x16xbf16>, vector<16x16xbf16>, vector<16x16xf32> -> vector<16x16xf32>
    %41 = vector.extract_strided_slice %21 {offsets = [0, 16], sizes = [16, 16], strides = [1, 1]} : vector<16x384xf32> to vector<16x16xf32>
    %42 = arith.truncf %41 : vector<16x16xf32> to vector<16x16xbf16>
    %43 = vector.extract_strided_slice %21 {offsets = [0, 144], sizes = [16, 16], strides = [1, 1]} : vector<16x384xf32> to vector<16x16xf32>
    %44 = arith.truncf %43 : vector<16x16xf32> to vector<16x16xbf16>
    %45 = vector.extract_strided_slice %21 {offsets = [0, 272], sizes = [16, 16], strides = [1, 1]} : vector<16x384xf32> to vector<16x16xf32>
    %46 = arith.truncf %45 : vector<16x16xf32> to vector<16x16xbf16>
    %cst_22 = arith.constant dense<0.000000e+00> : vector<16x16xf32>
    %47 = tpu.matmul %42, %44, %cst_22 {dimension_numbers = #tpu.dot_dimension_numbers<[1], [1], [0], [0], [0, 0, 1, 0], [], []>} : vector<16x16xbf16>, vector<16x16xbf16>, vector<16x16xf32> -> vector<16x16xf32>
    %cst_23 = arith.constant dense<0xFF800000> : vector<16xf32>
    %48 = vector.multi_reduction <maximumf>, %47, %cst_23 [1] : vector<16x16xf32> to vector<16xf32>
    %49 = vector.shape_cast %48 : vector<16xf32> to vector<16x1xf32>
    %50 = vector.broadcast %49 : vector<16x1xf32> to vector<16x16xf32>
    %51 = arith.subf %47, %50 : vector<16x16xf32>
    %52 = math.exp %51 : vector<16x16xf32>
    %cst_24 = arith.constant dense<0.000000e+00> : vector<16xf32>
    %53 = vector.multi_reduction <add>, %52, %cst_24 [1] : vector<16x16xf32> to vector<16xf32>
    %54 = vector.shape_cast %53 : vector<16xf32> to vector<16x1xf32>
    %55 = tpu.reciprocal %54 {approx = true} : vector<16x1xf32> -> vector<16x1xf32>
    %56 = vector.broadcast %55 : vector<16x1xf32> to vector<16x16xf32>
    %57 = arith.mulf %52, %56 : vector<16x16xf32>
    %58 = arith.truncf %57 : vector<16x16xf32> to vector<16x16xbf16>
    %cst_25 = arith.constant dense<0.000000e+00> : vector<16x16xf32>
    %59 = tpu.matmul %58, %46, %cst_25 {dimension_numbers = #tpu.dot_dimension_numbers<[1], [0], [0], [1], [0, 0, 1, 1], [], []>} : vector<16x16xbf16>, vector<16x16xbf16>, vector<16x16xf32> -> vector<16x16xf32>
    %60 = vector.extract_strided_slice %21 {offsets = [0, 32], sizes = [16, 16], strides = [1, 1]} : vector<16x384xf32> to vector<16x16xf32>
    %61 = arith.truncf %60 : vector<16x16xf32> to vector<16x16xbf16>
    %62 = vector.extract_strided_slice %21 {offsets = [0, 160], sizes = [16, 16], strides = [1, 1]} : vector<16x384xf32> to vector<16x16xf32>
    %63 = arith.truncf %62 : vector<16x16xf32> to vector<16x16xbf16>
    %64 = vector.extract_strided_slice %21 {offsets = [0, 288], sizes = [16, 16], strides = [1, 1]} : vector<16x384xf32> to vector<16x16xf32>
    %65 = arith.truncf %64 : vector<16x16xf32> to vector<16x16xbf16>
    %cst_26 = arith.constant dense<0.000000e+00> : vector<16x16xf32>
    %66 = tpu.matmul %61, %63, %cst_26 {dimension_numbers = #tpu.dot_dimension_numbers<[1], [1], [0], [0], [0, 0, 1, 0], [], []>} : vector<16x16xbf16>, vector<16x16xbf16>, vector<16x16xf32> -> vector<16x16xf32>
    %cst_27 = arith.constant dense<0xFF800000> : vector<16xf32>
    %67 = vector.multi_reduction <maximumf>, %66, %cst_27 [1] : vector<16x16xf32> to vector<16xf32>
    %68 = vector.shape_cast %67 : vector<16xf32> to vector<16x1xf32>
    %69 = vector.broadcast %68 : vector<16x1xf32> to vector<16x16xf32>
    %70 = arith.subf %66, %69 : vector<16x16xf32>
    %71 = math.exp %70 : vector<16x16xf32>
    %cst_28 = arith.constant dense<0.000000e+00> : vector<16xf32>
    %72 = vector.multi_reduction <add>, %71, %cst_28 [1] : vector<16x16xf32> to vector<16xf32>
    %73 = vector.shape_cast %72 : vector<16xf32> to vector<16x1xf32>
    %74 = tpu.reciprocal %73 {approx = true} : vector<16x1xf32> -> vector<16x1xf32>
    %75 = vector.broadcast %74 : vector<16x1xf32> to vector<16x16xf32>
    %76 = arith.mulf %71, %75 : vector<16x16xf32>
    %77 = arith.truncf %76 : vector<16x16xf32> to vector<16x16xbf16>
    %cst_29 = arith.constant dense<0.000000e+00> : vector<16x16xf32>
    %78 = tpu.matmul %77, %65, %cst_29 {dimension_numbers = #tpu.dot_dimension_numbers<[1], [0], [0], [1], [0, 0, 1, 1], [], []>} : vector<16x16xbf16>, vector<16x16xbf16>, vector<16x16xf32> -> vector<16x16xf32>
    %79 = vector.extract_strided_slice %21 {offsets = [0, 48], sizes = [16, 16], strides = [1, 1]} : vector<16x384xf32> to vector<16x16xf32>
    %80 = arith.truncf %79 : vector<16x16xf32> to vector<16x16xbf16>
    %81 = vector.extract_strided_slice %21 {offsets = [0, 176], sizes = [16, 16], strides = [1, 1]} : vector<16x384xf32> to vector<16x16xf32>
    %82 = arith.truncf %81 : vector<16x16xf32> to vector<16x16xbf16>
    %83 = vector.extract_strided_slice %21 {offsets = [0, 304], sizes = [16, 16], strides = [1, 1]} : vector<16x384xf32> to vector<16x16xf32>
    %84 = arith.truncf %83 : vector<16x16xf32> to vector<16x16xbf16>
    %cst_30 = arith.constant dense<0.000000e+00> : vector<16x16xf32>
    %85 = tpu.matmul %80, %82, %cst_30 {dimension_numbers = #tpu.dot_dimension_numbers<[1], [1], [0], [0], [0, 0, 1, 0], [], []>} : vector<16x16xbf16>, vector<16x16xbf16>, vector<16x16xf32> -> vector<16x16xf32>
    %cst_31 = arith.constant dense<0xFF800000> : vector<16xf32>
    %86 = vector.multi_reduction <maximumf>, %85, %cst_31 [1] : vector<16x16xf32> to vector<16xf32>
    %87 = vector.shape_cast %86 : vector<16xf32> to vector<16x1xf32>
    %88 = vector.broadcast %87 : vector<16x1xf32> to vector<16x16xf32>
    %89 = arith.subf %85, %88 : vector<16x16xf32>
    %90 = math.exp %89 : vector<16x16xf32>
    %cst_32 = arith.constant dense<0.000000e+00> : vector<16xf32>
    %91 = vector.multi_reduction <add>, %90, %cst_32 [1] : vector<16x16xf32> to vector<16xf32>
    %92 = vector.shape_cast %91 : vector<16xf32> to vector<16x1xf32>
    %93 = tpu.reciprocal %92 {approx = true} : vector<16x1xf32> -> vector<16x1xf32>
    %94 = vector.broadcast %93 : vector<16x1xf32> to vector<16x16xf32>
    %95 = arith.mulf %90, %94 : vector<16x16xf32>
    %96 = arith.truncf %95 : vector<16x16xf32> to vector<16x16xbf16>
    %cst_33 = arith.constant dense<0.000000e+00> : vector<16x16xf32>
    %97 = tpu.matmul %96, %84, %cst_33 {dimension_numbers = #tpu.dot_dimension_numbers<[1], [0], [0], [1], [0, 0, 1, 1], [], []>} : vector<16x16xbf16>, vector<16x16xbf16>, vector<16x16xf32> -> vector<16x16xf32>
    %98 = tpu.concatenate %40, %59, %78, %97 in 1 : vector<16x16xf32>, vector<16x16xf32>, vector<16x16xf32>, vector<16x16xf32> -> vector<16x64xf32>
    %99 = arith.truncf %98 : vector<16x64xf32> to vector<16x64xbf16>
    %c0_34 = arith.constant 0 : index
    %c512_35 = arith.constant 512 : index
    %100 = vector.load %arg3[%c0_34, %c512_35] : memref<64x1664xbf16, #tpu.memory_space<vmem>>, vector<64x64xbf16>
    %cst_36 = arith.constant dense<0.000000e+00> : vector<16x64xf32>
    %101 = tpu.matmul %99, %100, %cst_36 {dimension_numbers = #tpu.dot_dimension_numbers<[1], [0], [0], [1], [0, 0, 1, 1], [], []>} : vector<16x64xbf16>, vector<64x64xbf16>, vector<16x64xf32> -> vector<16x64xf32>
    %102 = arith.addf %12, %101 : vector<16x64xf32>
    %cst_37 = arith.constant dense<0.000000e+00> : vector<16xf32>
    %103 = vector.multi_reduction <add>, %102, %cst_37 [1] : vector<16x64xf32> to vector<16xf32>
    %104 = vector.shape_cast %103 : vector<16xf32> to vector<16x1xf32>
    %cst_38 = arith.constant 6.400000e+01 : f32
    %105 = vector.broadcast %cst_38 : f32 to vector<16x1xf32>
    %106 = arith.divf %104, %105 : vector<16x1xf32>
    %107 = arith.mulf %102, %102 : vector<16x64xf32>
    %cst_39 = arith.constant dense<0.000000e+00> : vector<16xf32>
    %108 = vector.multi_reduction <add>, %107, %cst_39 [1] : vector<16x64xf32> to vector<16xf32>
    %109 = vector.shape_cast %108 : vector<16xf32> to vector<16x1xf32>
    %cst_40 = arith.constant 6.400000e+01 : f32
    %110 = vector.broadcast %cst_40 : f32 to vector<16x1xf32>
    %111 = arith.divf %109, %110 : vector<16x1xf32>
    %112 = arith.mulf %106, %106 : vector<16x1xf32>
    %113 = arith.subf %111, %112 : vector<16x1xf32>
    %114 = vector.broadcast %106 : vector<16x1xf32> to vector<16x64xf32>
    %115 = arith.subf %102, %114 : vector<16x64xf32>
    %cst_41 = arith.constant 9.99999974E-6 : f32
    %116 = vector.broadcast %cst_41 : f32 to vector<16x1xf32>
    %117 = arith.addf %113, %116 : vector<16x1xf32>
    %118 = math.rsqrt %117 : vector<16x1xf32>
    %119 = vector.broadcast %118 : vector<16x1xf32> to vector<16x64xf32>
    %120 = arith.mulf %115, %119 : vector<16x64xf32>
    %121 = vector.broadcast %13 : vector<1x64xf32> to vector<16x64xf32>
    %122 = arith.mulf %120, %121 : vector<16x64xf32>
    %123 = vector.broadcast %14 : vector<1x64xf32> to vector<16x64xf32>
    %124 = arith.addf %122, %123 : vector<16x64xf32>
    %c0_42 = arith.constant 0 : index
    %c640_43 = arith.constant 640 : index
    %125 = vector.load %arg3[%c0_42, %c640_43] : memref<64x1664xbf16, #tpu.memory_space<vmem>>, vector<64x128xbf16>
    %c0_44 = arith.constant 0 : index
    %c768 = arith.constant 768 : index
    %126 = vector.load %arg3[%c0_44, %c768] : memref<64x1664xbf16, #tpu.memory_space<vmem>>, vector<64x128xbf16>
    %127 = arith.truncf %124 : vector<16x64xf32> to vector<16x64xbf16>
    %cst_45 = arith.constant dense<0.000000e+00> : vector<16x128xf32>
    %128 = tpu.matmul %127, %125, %cst_45 {dimension_numbers = #tpu.dot_dimension_numbers<[1], [0], [0], [1], [0, 0, 1, 1], [], []>} : vector<16x64xbf16>, vector<64x128xbf16>, vector<16x128xf32> -> vector<16x128xf32>
    %129 = vector.broadcast %15 : vector<1x128xf32> to vector<16x128xf32>
    %130 = arith.addf %128, %129 : vector<16x128xf32>
    %131 = arith.mulf %130, %130 : vector<16x128xf32>
    %132 = arith.mulf %130, %131 : vector<16x128xf32>
    %cst_46 = arith.constant 4.471500e-02 : f32
    %133 = vector.broadcast %cst_46 : f32 to vector<16x128xf32>
    %134 = arith.mulf %133, %132 : vector<16x128xf32>
    %135 = arith.addf %130, %134 : vector<16x128xf32>
    %cst_47 = arith.constant 0.797884583 : f32
    %136 = vector.broadcast %cst_47 : f32 to vector<16x128xf32>
    %137 = arith.mulf %136, %135 : vector<16x128xf32>
    %138 = math.tanh %137 : vector<16x128xf32>
    %cst_48 = arith.constant 1.000000e+00 : f32
    %139 = vector.broadcast %cst_48 : f32 to vector<16x128xf32>
    %140 = arith.addf %139, %138 : vector<16x128xf32>
    %cst_49 = arith.constant 5.000000e-01 : f32
    %141 = vector.broadcast %cst_49 : f32 to vector<16x128xf32>
    %142 = arith.mulf %141, %140 : vector<16x128xf32>
    %143 = arith.mulf %130, %142 : vector<16x128xf32>
    %144 = arith.truncf %143 : vector<16x128xf32> to vector<16x128xbf16>
    %cst_50 = arith.constant dense<0.000000e+00> : vector<16x64xf32>
    %145 = tpu.matmul %144, %126, %cst_50 {dimension_numbers = #tpu.dot_dimension_numbers<[1], [1], [0], [0], [0, 0, 1, 0], [], []>} : vector<16x128xbf16>, vector<64x128xbf16>, vector<16x64xf32> -> vector<16x64xf32>
    %146 = vector.broadcast %16 : vector<1x64xf32> to vector<16x64xf32>
    %147 = arith.addf %145, %146 : vector<16x64xf32>
    %148 = arith.addf %124, %147 : vector<16x64xf32>
    %cst_51 = arith.constant dense<0.000000e+00> : vector<16xf32>
    %149 = vector.multi_reduction <add>, %148, %cst_51 [1] : vector<16x64xf32> to vector<16xf32>
    %150 = vector.shape_cast %149 : vector<16xf32> to vector<16x1xf32>
    %cst_52 = arith.constant 6.400000e+01 : f32
    %151 = vector.broadcast %cst_52 : f32 to vector<16x1xf32>
    %152 = arith.divf %150, %151 : vector<16x1xf32>
    %153 = arith.mulf %148, %148 : vector<16x64xf32>
    %cst_53 = arith.constant dense<0.000000e+00> : vector<16xf32>
    %154 = vector.multi_reduction <add>, %153, %cst_53 [1] : vector<16x64xf32> to vector<16xf32>
    %155 = vector.shape_cast %154 : vector<16xf32> to vector<16x1xf32>
    %cst_54 = arith.constant 6.400000e+01 : f32
    %156 = vector.broadcast %cst_54 : f32 to vector<16x1xf32>
    %157 = arith.divf %155, %156 : vector<16x1xf32>
    %158 = arith.mulf %152, %152 : vector<16x1xf32>
    %159 = arith.subf %157, %158 : vector<16x1xf32>
    %160 = vector.broadcast %152 : vector<16x1xf32> to vector<16x64xf32>
    %161 = arith.subf %148, %160 : vector<16x64xf32>
    %cst_55 = arith.constant 9.99999974E-6 : f32
    %162 = vector.broadcast %cst_55 : f32 to vector<16x1xf32>
    %163 = arith.addf %159, %162 : vector<16x1xf32>
    %164 = math.rsqrt %163 : vector<16x1xf32>
    %165 = vector.broadcast %164 : vector<16x1xf32> to vector<16x64xf32>
    %166 = arith.mulf %161, %165 : vector<16x64xf32>
    %167 = vector.broadcast %17 : vector<1x64xf32> to vector<16x64xf32>
    %168 = arith.mulf %166, %167 : vector<16x64xf32>
    %169 = vector.broadcast %18 : vector<1x64xf32> to vector<16x64xf32>
    %170 = arith.addf %168, %169 : vector<16x64xf32>
    %c0_56 = arith.constant 0 : index
    %c768_57 = arith.constant 768 : index
    %171 = vector.load %arg5[%c0_56, %c768_57] : memref<1x1664xf32, #tpu.memory_space<vmem>>, vector<1x64xf32>
    %c0_58 = arith.constant 0 : index
    %c896 = arith.constant 896 : index
    %172 = vector.load %arg5[%c0_58, %c896] : memref<1x1664xf32, #tpu.memory_space<vmem>>, vector<1x64xf32>
    %c0_59 = arith.constant 0 : index
    %c1024 = arith.constant 1024 : index
    %173 = vector.load %arg5[%c0_59, %c1024] : memref<1x1664xf32, #tpu.memory_space<vmem>>, vector<1x128xf32>
    %c0_60 = arith.constant 0 : index
    %c1152 = arith.constant 1152 : index
    %174 = vector.load %arg5[%c0_60, %c1152] : memref<1x1664xf32, #tpu.memory_space<vmem>>, vector<1x64xf32>
    %c0_61 = arith.constant 0 : index
    %c1280 = arith.constant 1280 : index
    %175 = vector.load %arg5[%c0_61, %c1280] : memref<1x1664xf32, #tpu.memory_space<vmem>>, vector<1x64xf32>
    %c0_62 = arith.constant 0 : index
    %c1408 = arith.constant 1408 : index
    %176 = vector.load %arg5[%c0_62, %c1408] : memref<1x1664xf32, #tpu.memory_space<vmem>>, vector<1x64xf32>
    %177 = arith.truncf %170 : vector<16x64xf32> to vector<16x64xbf16>
    %c0_63 = arith.constant 0 : index
    %c896_64 = arith.constant 896 : index
    %178 = vector.load %arg3[%c0_63, %c896_64] : memref<64x1664xbf16, #tpu.memory_space<vmem>>, vector<64x384xbf16>
    %cst_65 = arith.constant dense<0.000000e+00> : vector<16x384xf32>
    %179 = tpu.matmul %177, %178, %cst_65 {dimension_numbers = #tpu.dot_dimension_numbers<[1], [0], [0], [1], [0, 0, 1, 1], [], []>} : vector<16x64xbf16>, vector<64x384xbf16>, vector<16x384xf32> -> vector<16x384xf32>
    %180 = vector.extract_strided_slice %179 {offsets = [0, 0], sizes = [16, 16], strides = [1, 1]} : vector<16x384xf32> to vector<16x16xf32>
    %181 = arith.truncf %180 : vector<16x16xf32> to vector<16x16xbf16>
    %182 = vector.extract_strided_slice %179 {offsets = [0, 128], sizes = [16, 16], strides = [1, 1]} : vector<16x384xf32> to vector<16x16xf32>
    %183 = arith.truncf %182 : vector<16x16xf32> to vector<16x16xbf16>
    %184 = vector.extract_strided_slice %179 {offsets = [0, 256], sizes = [16, 16], strides = [1, 1]} : vector<16x384xf32> to vector<16x16xf32>
    %185 = arith.truncf %184 : vector<16x16xf32> to vector<16x16xbf16>
    %cst_66 = arith.constant dense<0.000000e+00> : vector<16x16xf32>
    %186 = tpu.matmul %181, %183, %cst_66 {dimension_numbers = #tpu.dot_dimension_numbers<[1], [1], [0], [0], [0, 0, 1, 0], [], []>} : vector<16x16xbf16>, vector<16x16xbf16>, vector<16x16xf32> -> vector<16x16xf32>
    %cst_67 = arith.constant dense<0xFF800000> : vector<16xf32>
    %187 = vector.multi_reduction <maximumf>, %186, %cst_67 [1] : vector<16x16xf32> to vector<16xf32>
    %188 = vector.shape_cast %187 : vector<16xf32> to vector<16x1xf32>
    %189 = vector.broadcast %188 : vector<16x1xf32> to vector<16x16xf32>
    %190 = arith.subf %186, %189 : vector<16x16xf32>
    %191 = math.exp %190 : vector<16x16xf32>
    %cst_68 = arith.constant dense<0.000000e+00> : vector<16xf32>
    %192 = vector.multi_reduction <add>, %191, %cst_68 [1] : vector<16x16xf32> to vector<16xf32>
    %193 = vector.shape_cast %192 : vector<16xf32> to vector<16x1xf32>
    %194 = tpu.reciprocal %193 {approx = true} : vector<16x1xf32> -> vector<16x1xf32>
    %195 = vector.broadcast %194 : vector<16x1xf32> to vector<16x16xf32>
    %196 = arith.mulf %191, %195 : vector<16x16xf32>
    %197 = arith.truncf %196 : vector<16x16xf32> to vector<16x16xbf16>
    %cst_69 = arith.constant dense<0.000000e+00> : vector<16x16xf32>
    %198 = tpu.matmul %197, %185, %cst_69 {dimension_numbers = #tpu.dot_dimension_numbers<[1], [0], [0], [1], [0, 0, 1, 1], [], []>} : vector<16x16xbf16>, vector<16x16xbf16>, vector<16x16xf32> -> vector<16x16xf32>
    %199 = vector.extract_strided_slice %179 {offsets = [0, 16], sizes = [16, 16], strides = [1, 1]} : vector<16x384xf32> to vector<16x16xf32>
    %200 = arith.truncf %199 : vector<16x16xf32> to vector<16x16xbf16>
    %201 = vector.extract_strided_slice %179 {offsets = [0, 144], sizes = [16, 16], strides = [1, 1]} : vector<16x384xf32> to vector<16x16xf32>
    %202 = arith.truncf %201 : vector<16x16xf32> to vector<16x16xbf16>
    %203 = vector.extract_strided_slice %179 {offsets = [0, 272], sizes = [16, 16], strides = [1, 1]} : vector<16x384xf32> to vector<16x16xf32>
    %204 = arith.truncf %203 : vector<16x16xf32> to vector<16x16xbf16>
    %cst_70 = arith.constant dense<0.000000e+00> : vector<16x16xf32>
    %205 = tpu.matmul %200, %202, %cst_70 {dimension_numbers = #tpu.dot_dimension_numbers<[1], [1], [0], [0], [0, 0, 1, 0], [], []>} : vector<16x16xbf16>, vector<16x16xbf16>, vector<16x16xf32> -> vector<16x16xf32>
    %cst_71 = arith.constant dense<0xFF800000> : vector<16xf32>
    %206 = vector.multi_reduction <maximumf>, %205, %cst_71 [1] : vector<16x16xf32> to vector<16xf32>
    %207 = vector.shape_cast %206 : vector<16xf32> to vector<16x1xf32>
    %208 = vector.broadcast %207 : vector<16x1xf32> to vector<16x16xf32>
    %209 = arith.subf %205, %208 : vector<16x16xf32>
    %210 = math.exp %209 : vector<16x16xf32>
    %cst_72 = arith.constant dense<0.000000e+00> : vector<16xf32>
    %211 = vector.multi_reduction <add>, %210, %cst_72 [1] : vector<16x16xf32> to vector<16xf32>
    %212 = vector.shape_cast %211 : vector<16xf32> to vector<16x1xf32>
    %213 = tpu.reciprocal %212 {approx = true} : vector<16x1xf32> -> vector<16x1xf32>
    %214 = vector.broadcast %213 : vector<16x1xf32> to vector<16x16xf32>
    %215 = arith.mulf %210, %214 : vector<16x16xf32>
    %216 = arith.truncf %215 : vector<16x16xf32> to vector<16x16xbf16>
    %cst_73 = arith.constant dense<0.000000e+00> : vector<16x16xf32>
    %217 = tpu.matmul %216, %204, %cst_73 {dimension_numbers = #tpu.dot_dimension_numbers<[1], [0], [0], [1], [0, 0, 1, 1], [], []>} : vector<16x16xbf16>, vector<16x16xbf16>, vector<16x16xf32> -> vector<16x16xf32>
    %218 = vector.extract_strided_slice %179 {offsets = [0, 32], sizes = [16, 16], strides = [1, 1]} : vector<16x384xf32> to vector<16x16xf32>
    %219 = arith.truncf %218 : vector<16x16xf32> to vector<16x16xbf16>
    %220 = vector.extract_strided_slice %179 {offsets = [0, 160], sizes = [16, 16], strides = [1, 1]} : vector<16x384xf32> to vector<16x16xf32>
    %221 = arith.truncf %220 : vector<16x16xf32> to vector<16x16xbf16>
    %222 = vector.extract_strided_slice %179 {offsets = [0, 288], sizes = [16, 16], strides = [1, 1]} : vector<16x384xf32> to vector<16x16xf32>
    %223 = arith.truncf %222 : vector<16x16xf32> to vector<16x16xbf16>
    %cst_74 = arith.constant dense<0.000000e+00> : vector<16x16xf32>
    %224 = tpu.matmul %219, %221, %cst_74 {dimension_numbers = #tpu.dot_dimension_numbers<[1], [1], [0], [0], [0, 0, 1, 0], [], []>} : vector<16x16xbf16>, vector<16x16xbf16>, vector<16x16xf32> -> vector<16x16xf32>
    %cst_75 = arith.constant dense<0xFF800000> : vector<16xf32>
    %225 = vector.multi_reduction <maximumf>, %224, %cst_75 [1] : vector<16x16xf32> to vector<16xf32>
    %226 = vector.shape_cast %225 : vector<16xf32> to vector<16x1xf32>
    %227 = vector.broadcast %226 : vector<16x1xf32> to vector<16x16xf32>
    %228 = arith.subf %224, %227 : vector<16x16xf32>
    %229 = math.exp %228 : vector<16x16xf32>
    %cst_76 = arith.constant dense<0.000000e+00> : vector<16xf32>
    %230 = vector.multi_reduction <add>, %229, %cst_76 [1] : vector<16x16xf32> to vector<16xf32>
    %231 = vector.shape_cast %230 : vector<16xf32> to vector<16x1xf32>
    %232 = tpu.reciprocal %231 {approx = true} : vector<16x1xf32> -> vector<16x1xf32>
    %233 = vector.broadcast %232 : vector<16x1xf32> to vector<16x16xf32>
    %234 = arith.mulf %229, %233 : vector<16x16xf32>
    %235 = arith.truncf %234 : vector<16x16xf32> to vector<16x16xbf16>
    %cst_77 = arith.constant dense<0.000000e+00> : vector<16x16xf32>
    %236 = tpu.matmul %235, %223, %cst_77 {dimension_numbers = #tpu.dot_dimension_numbers<[1], [0], [0], [1], [0, 0, 1, 1], [], []>} : vector<16x16xbf16>, vector<16x16xbf16>, vector<16x16xf32> -> vector<16x16xf32>
    %237 = vector.extract_strided_slice %179 {offsets = [0, 48], sizes = [16, 16], strides = [1, 1]} : vector<16x384xf32> to vector<16x16xf32>
    %238 = arith.truncf %237 : vector<16x16xf32> to vector<16x16xbf16>
    %239 = vector.extract_strided_slice %179 {offsets = [0, 176], sizes = [16, 16], strides = [1, 1]} : vector<16x384xf32> to vector<16x16xf32>
    %240 = arith.truncf %239 : vector<16x16xf32> to vector<16x16xbf16>
    %241 = vector.extract_strided_slice %179 {offsets = [0, 304], sizes = [16, 16], strides = [1, 1]} : vector<16x384xf32> to vector<16x16xf32>
    %242 = arith.truncf %241 : vector<16x16xf32> to vector<16x16xbf16>
    %cst_78 = arith.constant dense<0.000000e+00> : vector<16x16xf32>
    %243 = tpu.matmul %238, %240, %cst_78 {dimension_numbers = #tpu.dot_dimension_numbers<[1], [1], [0], [0], [0, 0, 1, 0], [], []>} : vector<16x16xbf16>, vector<16x16xbf16>, vector<16x16xf32> -> vector<16x16xf32>
    %cst_79 = arith.constant dense<0xFF800000> : vector<16xf32>
    %244 = vector.multi_reduction <maximumf>, %243, %cst_79 [1] : vector<16x16xf32> to vector<16xf32>
    %245 = vector.shape_cast %244 : vector<16xf32> to vector<16x1xf32>
    %246 = vector.broadcast %245 : vector<16x1xf32> to vector<16x16xf32>
    %247 = arith.subf %243, %246 : vector<16x16xf32>
    %248 = math.exp %247 : vector<16x16xf32>
    %cst_80 = arith.constant dense<0.000000e+00> : vector<16xf32>
    %249 = vector.multi_reduction <add>, %248, %cst_80 [1] : vector<16x16xf32> to vector<16xf32>
    %250 = vector.shape_cast %249 : vector<16xf32> to vector<16x1xf32>
    %251 = tpu.reciprocal %250 {approx = true} : vector<16x1xf32> -> vector<16x1xf32>
    %252 = vector.broadcast %251 : vector<16x1xf32> to vector<16x16xf32>
    %253 = arith.mulf %248, %252 : vector<16x16xf32>
    %254 = arith.truncf %253 : vector<16x16xf32> to vector<16x16xbf16>
    %cst_81 = arith.constant dense<0.000000e+00> : vector<16x16xf32>
    %255 = tpu.matmul %254, %242, %cst_81 {dimension_numbers = #tpu.dot_dimension_numbers<[1], [0], [0], [1], [0, 0, 1, 1], [], []>} : vector<16x16xbf16>, vector<16x16xbf16>, vector<16x16xf32> -> vector<16x16xf32>
    %256 = tpu.concatenate %198, %217, %236, %255 in 1 : vector<16x16xf32>, vector<16x16xf32>, vector<16x16xf32>, vector<16x16xf32> -> vector<16x64xf32>
    %257 = arith.truncf %256 : vector<16x64xf32> to vector<16x64xbf16>
    %c0_82 = arith.constant 0 : index
    %c1280_83 = arith.constant 1280 : index
    %258 = vector.load %arg3[%c0_82, %c1280_83] : memref<64x1664xbf16, #tpu.memory_space<vmem>>, vector<64x64xbf16>
    %cst_84 = arith.constant dense<0.000000e+00> : vector<16x64xf32>
    %259 = tpu.matmul %257, %258, %cst_84 {dimension_numbers = #tpu.dot_dimension_numbers<[1], [0], [0], [1], [0, 0, 1, 1], [], []>} : vector<16x64xbf16>, vector<64x64xbf16>, vector<16x64xf32> -> vector<16x64xf32>
    %260 = arith.addf %170, %259 : vector<16x64xf32>
    %cst_85 = arith.constant dense<0.000000e+00> : vector<16xf32>
    %261 = vector.multi_reduction <add>, %260, %cst_85 [1] : vector<16x64xf32> to vector<16xf32>
    %262 = vector.shape_cast %261 : vector<16xf32> to vector<16x1xf32>
    %cst_86 = arith.constant 6.400000e+01 : f32
    %263 = vector.broadcast %cst_86 : f32 to vector<16x1xf32>
    %264 = arith.divf %262, %263 : vector<16x1xf32>
    %265 = arith.mulf %260, %260 : vector<16x64xf32>
    %cst_87 = arith.constant dense<0.000000e+00> : vector<16xf32>
    %266 = vector.multi_reduction <add>, %265, %cst_87 [1] : vector<16x64xf32> to vector<16xf32>
    %267 = vector.shape_cast %266 : vector<16xf32> to vector<16x1xf32>
    %cst_88 = arith.constant 6.400000e+01 : f32
    %268 = vector.broadcast %cst_88 : f32 to vector<16x1xf32>
    %269 = arith.divf %267, %268 : vector<16x1xf32>
    %270 = arith.mulf %264, %264 : vector<16x1xf32>
    %271 = arith.subf %269, %270 : vector<16x1xf32>
    %272 = vector.broadcast %264 : vector<16x1xf32> to vector<16x64xf32>
    %273 = arith.subf %260, %272 : vector<16x64xf32>
    %cst_89 = arith.constant 9.99999974E-6 : f32
    %274 = vector.broadcast %cst_89 : f32 to vector<16x1xf32>
    %275 = arith.addf %271, %274 : vector<16x1xf32>
    %276 = math.rsqrt %275 : vector<16x1xf32>
    %277 = vector.broadcast %276 : vector<16x1xf32> to vector<16x64xf32>
    %278 = arith.mulf %273, %277 : vector<16x64xf32>
    %279 = vector.broadcast %171 : vector<1x64xf32> to vector<16x64xf32>
    %280 = arith.mulf %278, %279 : vector<16x64xf32>
    %281 = vector.broadcast %172 : vector<1x64xf32> to vector<16x64xf32>
    %282 = arith.addf %280, %281 : vector<16x64xf32>
    %c0_90 = arith.constant 0 : index
    %c1408_91 = arith.constant 1408 : index
    %283 = vector.load %arg3[%c0_90, %c1408_91] : memref<64x1664xbf16, #tpu.memory_space<vmem>>, vector<64x128xbf16>
    %c0_92 = arith.constant 0 : index
    %c1536 = arith.constant 1536 : index
    %284 = vector.load %arg3[%c0_92, %c1536] : memref<64x1664xbf16, #tpu.memory_space<vmem>>, vector<64x128xbf16>
    %285 = arith.truncf %282 : vector<16x64xf32> to vector<16x64xbf16>
    %cst_93 = arith.constant dense<0.000000e+00> : vector<16x128xf32>
    %286 = tpu.matmul %285, %283, %cst_93 {dimension_numbers = #tpu.dot_dimension_numbers<[1], [0], [0], [1], [0, 0, 1, 1], [], []>} : vector<16x64xbf16>, vector<64x128xbf16>, vector<16x128xf32> -> vector<16x128xf32>
    %287 = vector.broadcast %173 : vector<1x128xf32> to vector<16x128xf32>
    %288 = arith.addf %286, %287 : vector<16x128xf32>
    %289 = arith.mulf %288, %288 : vector<16x128xf32>
    %290 = arith.mulf %288, %289 : vector<16x128xf32>
    %cst_94 = arith.constant 4.471500e-02 : f32
    %291 = vector.broadcast %cst_94 : f32 to vector<16x128xf32>
    %292 = arith.mulf %291, %290 : vector<16x128xf32>
    %293 = arith.addf %288, %292 : vector<16x128xf32>
    %cst_95 = arith.constant 0.797884583 : f32
    %294 = vector.broadcast %cst_95 : f32 to vector<16x128xf32>
    %295 = arith.mulf %294, %293 : vector<16x128xf32>
    %296 = math.tanh %295 : vector<16x128xf32>
    %cst_96 = arith.constant 1.000000e+00 : f32
    %297 = vector.broadcast %cst_96 : f32 to vector<16x128xf32>
    %298 = arith.addf %297, %296 : vector<16x128xf32>
    %cst_97 = arith.constant 5.000000e-01 : f32
    %299 = vector.broadcast %cst_97 : f32 to vector<16x128xf32>
    %300 = arith.mulf %299, %298 : vector<16x128xf32>
    %301 = arith.mulf %288, %300 : vector<16x128xf32>
    %302 = arith.truncf %301 : vector<16x128xf32> to vector<16x128xbf16>
    %cst_98 = arith.constant dense<0.000000e+00> : vector<16x64xf32>
    %303 = tpu.matmul %302, %284, %cst_98 {dimension_numbers = #tpu.dot_dimension_numbers<[1], [1], [0], [0], [0, 0, 1, 0], [], []>} : vector<16x128xbf16>, vector<64x128xbf16>, vector<16x64xf32> -> vector<16x64xf32>
    %304 = vector.broadcast %174 : vector<1x64xf32> to vector<16x64xf32>
    %305 = arith.addf %303, %304 : vector<16x64xf32>
    %306 = arith.addf %282, %305 : vector<16x64xf32>
    %cst_99 = arith.constant dense<0.000000e+00> : vector<16xf32>
    %307 = vector.multi_reduction <add>, %306, %cst_99 [1] : vector<16x64xf32> to vector<16xf32>
    %308 = vector.shape_cast %307 : vector<16xf32> to vector<16x1xf32>
    %cst_100 = arith.constant 6.400000e+01 : f32
    %309 = vector.broadcast %cst_100 : f32 to vector<16x1xf32>
    %310 = arith.divf %308, %309 : vector<16x1xf32>
    %311 = arith.mulf %306, %306 : vector<16x64xf32>
    %cst_101 = arith.constant dense<0.000000e+00> : vector<16xf32>
    %312 = vector.multi_reduction <add>, %311, %cst_101 [1] : vector<16x64xf32> to vector<16xf32>
    %313 = vector.shape_cast %312 : vector<16xf32> to vector<16x1xf32>
    %cst_102 = arith.constant 6.400000e+01 : f32
    %314 = vector.broadcast %cst_102 : f32 to vector<16x1xf32>
    %315 = arith.divf %313, %314 : vector<16x1xf32>
    %316 = arith.mulf %310, %310 : vector<16x1xf32>
    %317 = arith.subf %315, %316 : vector<16x1xf32>
    %318 = vector.broadcast %310 : vector<16x1xf32> to vector<16x64xf32>
    %319 = arith.subf %306, %318 : vector<16x64xf32>
    %cst_103 = arith.constant 9.99999974E-6 : f32
    %320 = vector.broadcast %cst_103 : f32 to vector<16x1xf32>
    %321 = arith.addf %317, %320 : vector<16x1xf32>
    %322 = math.rsqrt %321 : vector<16x1xf32>
    %323 = vector.broadcast %322 : vector<16x1xf32> to vector<16x64xf32>
    %324 = arith.mulf %319, %323 : vector<16x64xf32>
    %325 = vector.broadcast %175 : vector<1x64xf32> to vector<16x64xf32>
    %326 = arith.mulf %324, %325 : vector<16x64xf32>
    %327 = vector.broadcast %176 : vector<1x64xf32> to vector<16x64xf32>
    %328 = arith.addf %326, %327 : vector<16x64xf32>
    %c0_104 = arith.constant 0 : index
    %c1536_105 = arith.constant 1536 : index
    %329 = vector.load %arg5[%c0_104, %c1536_105] : memref<1x1664xf32, #tpu.memory_space<vmem>>, vector<1x64xf32>
    %c0_106 = arith.constant 0 : index
    %c1600 = arith.constant 1600 : index
    %330 = vector.load %arg5[%c0_106, %c1600] : memref<1x1664xf32, #tpu.memory_space<vmem>>, vector<1x1xf32>
    %331 = vector.broadcast %329 : vector<1x64xf32> to vector<16x64xf32>
    %332 = arith.mulf %328, %331 : vector<16x64xf32>
    %cst_107 = arith.constant dense<0.000000e+00> : vector<16xf32>
    %333 = vector.multi_reduction <add>, %332, %cst_107 [1] : vector<16x64xf32> to vector<16xf32>
    %334 = vector.shape_cast %333 : vector<16xf32> to vector<16x1xf32>
    %335 = arith.index_cast %arg0 : i32 to index
    %336 = memref.load %arg1[%335] : memref<1xi32, #tpu.memory_space<smem>>
    %337 = tpu.iota {dimensions = array<i32: 0>} : vector<16x1xi32>
    %338 = vector.broadcast %336 : i32 to vector<16x1xi32>
    %339 = arith.cmpi eq, %337, %338 : vector<16x1xi32>
    %cst_108 = arith.constant 0.000000e+00 : f32
    %340 = vector.broadcast %cst_108 : f32 to vector<16x1xf32>
    %341 = arith.select %339, %334, %340 : vector<16x1xi1>, vector<16x1xf32>
    %cst_109 = arith.constant dense<0.000000e+00> : vector<1xf32>
    %342 = vector.multi_reduction <add>, %341, %cst_109 [0] : vector<16x1xf32> to vector<1xf32>
    %343 = vector.shape_cast %342 : vector<1xf32> to vector<1x1xf32>
    %344 = arith.addf %343, %330 : vector<1x1xf32>
    %c0_110 = arith.constant 0 : index
    %c0_111 = arith.constant 0 : index
    %c0_112 = arith.constant 0 : index
    %345 = vector.load %arg6[%c0_110, %c0_111, %c0_112] : memref<1x1x1xf32, #tpu.memory_space<vmem>>, vector<1x1x1xf32>
    %346 = vector.shape_cast %345 : vector<1x1x1xf32> to vector<1x1xf32>
    %347 = vector.shape_cast %344 : vector<1x1xf32> to vector<1x1x1xf32>
    tpu.vector_store %arg6[%c0_110, %c0_111, %c0_112], %347 {strides = array<i32>} : memref<1x1x1xf32, #tpu.memory_space<vmem>>, vector<1x1x1xf32>,
    return
  }
  func.func @transform_0(%arg0: i32, %arg1: memref<1xi32, #tpu.memory_space<smem>>) -> (i32, i32, i32) {
    %c0_i32 = arith.constant 0 : i32
    %c0_i32_0 = arith.constant 0 : i32
    %c0_i32_1 = arith.constant 0 : i32
    return %arg0, %c0_i32, %c0_i32_0 : i32, i32, i32
  }
  func.func @transform_1(%arg0: i32, %arg1: memref<1xi32, #tpu.memory_space<smem>>) -> (i32, i32) {
    %c0_i32 = arith.constant 0 : i32
    %c0_i32_0 = arith.constant 0 : i32
    %c0_i32_1 = arith.constant 0 : i32
    return %c0_i32, %c0_i32_0 : i32, i32
  }
  func.func @transform_2(%arg0: i32, %arg1: memref<1xi32, #tpu.memory_space<smem>>) -> (i32, i32) {
    %c0_i32 = arith.constant 0 : i32
    %c0_i32_0 = arith.constant 0 : i32
    %c0_i32_1 = arith.constant 0 : i32
    return %c0_i32, %c0_i32_0 : i32, i32
  }
  func.func @transform_3(%arg0: i32, %arg1: memref<1xi32, #tpu.memory_space<smem>>) -> (i32, i32) {
    %c0_i32 = arith.constant 0 : i32
    %c0_i32_0 = arith.constant 0 : i32
    %c0_i32_1 = arith.constant 0 : i32
    return %c0_i32, %c0_i32_0 : i32, i32
  }
  func.func @transform_4(%arg0: i32, %arg1: memref<1xi32, #tpu.memory_space<smem>>) -> (i32, i32, i32) {
    %c0_i32 = arith.constant 0 : i32
    %c0_i32_0 = arith.constant 0 : i32
    %c0_i32_1 = arith.constant 0 : i32
    return %arg0, %c0_i32, %c0_i32_0 : i32, i32, i32
  }
}

</mosaic_0001>

<bundles_post_ra>
// kernel: tpu_custom_call.1
= control target key start
LH: loop header
LB: loop body
LE: loop exit
PB: predicated region body
PF: predicated region fallthrough
CT: control target
= control target key end

     0   :  { %11 = vsyncpa [#allocation5], 0  ;;  %s3240_s0 = inlined_call_operand.<no memory space> [shape: s32[1], index: 0, kind: input, shape index: {}]   ;;  %s3241_s1 = inlined_call_operand.vmem [shape: s32[1,16,1], index: 1, kind: input, shape index: {}]   ;;  %s3242_s2 = inlined_call_operand.hbm [shape: bf16[64,1664], index: 2, kind: input, shape index: {}]   ;;  %s3243_s3 = inlined_call_operand.vmem [shape: f32[16,64], index: 3, kind: input, shape index: {}]   ;;  %s3244_s4 = inlined_call_operand.hbm [shape: f32[1,1664], index: 4, kind: input, shape index: {}]   ;;  %s3245_s5 = inlined_call_operand.hbm [shape: f32[1,1,1], index: 5, kind: output, shape index: {}]  }
   0x1   :  { %12 = vsyncpa [#allocation8], 0 }
   0x2   :  { %13 = vsyncpa [#allocation6], 0  ;;  %s2915_s18 = smov [#allocation4]  }
   0x3   :  { %s21_s19 = sshll.u32 %s2915_s18, 4  ;;  %s22_s19 = int_to_ptr.vmem [resolvable:$true] %s21_s19 }
   0x4   :  { %s2857_s20 = scalar_lea.vmem %s22_s19, 6656  ;;  %p2862_p1 = scmp.lt.s32.totalorder %s22_s19, %s22_s19 }
   0x5   :  { %p2858_p0 = scmp.ne.s32.totalorder %s22_s19, %s2857_s20  ;;  %p2863_p2 = scmp.lt.s32.totalorder %s2857_s20, %s2857_s20 }
   0x7   :  { %p2864_p3 = por %p2863_p2, %p2862_p1 }
   0x9   :  { %p2865_p4 = pnand %p2864_p3, %p2858_p0 }
   0xb   :  { %2868 = shalt.err (!%p2865_p4)
}
   0xc   :  { %s2916_s21 = smov 832   ;;  %s2917_s22 = smov 52  }
   0xd   :  { %27 = dma.hbm_to_vmem [thread:$0]  %s3242_s2, 6656, %s22_s19, [#allocation5], %s2916_s21, %s2916_s21, %s2917_s22  }
   0xe   :  { %s2918_s25 = smov [#allocation7]  }
   0xf   :  { %s36_s26 = sshll.u32 %s2918_s25, 4  ;;  %s37_s26 = int_to_ptr.vmem [resolvable:$true] %s36_s26 }
  0x10   :  { %s2877_s27 = scalar_lea.vmem %s37_s26, 208  ;;  %s2881_s28 = scalar_lea.vmem %s37_s26, 224 }
  0x11   :  { %p2878_p5 = scmp.ne.s32.totalorder %s37_s26, %s2877_s27  ;;  %p2882_p6 = scmp.lt.s32.totalorder %s37_s26, %s37_s26 }
  0x12   :  { %p2883_p7 = scmp.lt.s32.totalorder %s2881_s28, %s2877_s27 }
  0x14   :  { %p2884_p8 = por %p2883_p7, %p2882_p6 }
  0x16   :  { %p2885_p9 = pnand %p2884_p8, %p2878_p5 }
  0x18   :  { %2888 = shalt.err (!%p2885_p9)
}
  0x19   :  { %39 = dma.hbm_to_vmem [thread:$0]  %s3244_s4, 208, %s37_s26, [#allocation8]  }
  0x1a   :  { %2909 = dma.done.wait [#allocation5], 6656  }
  0x1b   :  { %2910 = vsyncadd [#allocation5], 4294960640 }
  0x1c   :  { %2911 = dma.done.wait [#allocation8], 208  }
  0x1d   :  { %2912 = vsyncadd [#allocation8], 4294967088  ;;  %v2919_v0 = vmov 0   ;;  %v2920_v1 = vmov 0.0   ;;  %v47_v2 = vld [vmem:[%s3241_s1] sm:$0xff]  ;;  %v48_v4 = vld [vmem:[%s3241_s1 + $0x8] sm:$0xff]  ;;  %v49_v11 = vlaneseq }
  0x1e   :  { %2670 = vset.pattern.permute.xlu0 %v2919_v0  ;;  %2451 = vmatprep.subr.bf16.mxu1 %v2920_v1  ;;  %v2701_v3 = vld [vmem:[#allocation4 + $0x138] ss:$52 sps:$4 sm:$0xff]   ;;  %v2702_v5 = vld [vmem:[#allocation4 + $0xd0] ss:$52 sps:$4 sm:$0xff]   ;;  %vm2921_vm0 = vmmov 0   ;;  %vm96_vm3 = vcmask 523264  }
  0x1f   :  { %2463 = vmatprep.subr.bf16.mxu0 %v2920_v1  ;;  %52 = vperm.xlu0 %2670, %v47_v2   ;;  %v2703_v6 = vld [vmem:[#allocation4 + $0x68] ss:$52 sps:$4 sm:$0xff]   ;;  %v2708_v7 = vld [vmem:[#allocation4 + $0x144] ss:$52 sps:$4 sm:$0xff]   ;;  %v2704_v8 = vld [vmem:[#allocation4] ss:$52 sps:$4 sm:$0xff]  }
  0x20   :  { %2452 = vmatpush3.bf16.msra.mxu1 %v2701_v3  ;;  %2459 = vmatprep.mubr.msk.bf16.mxu1 %vm2921_vm0, %v2920_v1  ;;  %v2707_v9 = vld [vmem:[#allocation4 + $0x140] ss:$52 sps:$4 sm:$0xff]   ;;  %v2712_v10 = vld [vmem:[#allocation4 + $0xdc] ss:$52 sps:$4 sm:$0xff]   ;;  %v50_v12 = vand.u32 127, %v49_v11  ;;  %v71_v30 = vld [vmem:[%s3243_s3 + $0x8] sm:$0xff] }
  0x21   :  { %2453 = vmatprep.subr.bf16.mxu1 %v2920_v1  ;;  %2471 = vmatprep.mubr.msk.bf16.mxu0 %vm2921_vm0, %v2920_v1  ;;  %v2705_v17 = vld [vmem:[#allocation4 + $0x13c] ss:$52 sps:$4 sm:$0xff]   ;;  %v2711_v19 = vld [vmem:[#allocation4 + $0xd8] ss:$52 sps:$4 sm:$0xff]   ;;  %v2709_v20 = vld [vmem:[#allocation4 + $0xd4] ss:$52 sps:$4 sm:$0xff]  }
  0x22   :  { %2464 = vmatpush3.bf16.msra.mxu0 %v2708_v7  ;;  %v2715_v21 = vld [vmem:[#allocation4 + $0x70] ss:$52 sps:$4 sm:$0xff]   ;;  %v2713_v22 = vld [vmem:[#allocation4 + $0x6c] ss:$52 sps:$4 sm:$0xff]   ;;  %v2716_v23 = vld [vmem:[#allocation4 + $0x74] ss:$52 sps:$4 sm:$0xff]  }
  0x23   :  { %55 = vperm.xlu0 %2670, %v48_v4   ;;  %2465 = vmatprep.subr.bf16.mxu0 %v2920_v1  ;;  %v2719_v24 = vld [vmem:[#allocation4 + $0x8] ss:$52 sps:$4 sm:$0xff]   ;;  %v2717_v25 = vld [vmem:[#allocation4 + $0x4] ss:$52 sps:$4 sm:$0xff]   ;;  %v2720_v26 = vld [vmem:[#allocation4 + $0xc] ss:$52 sps:$4 sm:$0xff]  }
  0x24   :  { %2454 = vmatpush3.bf16.msra.mxu1 %v2702_v5  ;;  %v70_v28 = vld [vmem:[%s3243_s3] sm:$0xff]  ;;  %vm318_vm4 = vcmask 130048   ;;  %s2922_s3 = smov 96   ;;  %s2923_s11 = smov 112   ;;  %vm825_vm5 = vcmask 261120   ;;  %vm828_vm6 = vcmask 392192  }
  0x25   :  { %2455 = vmatprep.subr.bf16.mxu1 %v2920_v1  ;;  %s2924_s12 = smov 80   ;;  %s2925_s13 = smov 16   ;;  %vm2267_vm9 = vcmask 0  }
  0x26   :  { %2466 = vmatpush3.bf16.msra.mxu0 %v2712_v10  ;;  %s2926_s14 = smov 32   ;;  %s2927_s15 = smov 48  }
  0x27   :  { %2467 = vmatprep.subr.bf16.mxu0 %v2920_v1  ;;  %s2928_s18 = smov 64   ;;  %s2929_s19 = smov [#allocation9]  }
  0x28   :  { %2456 = vmatpush3.bf16.msra.mxu1 %v2703_v6  ;;  %s2275_s20 = sshll.u32 %s2929_s19, 4  ;;  %s2276_s20 = int_to_ptr.vmem [resolvable:$true] %s2275_s20 }
  0x29   :  { %2457 = vmatprep.subr.bf16.mxu1 %v2920_v1  ;;  %s2893_s21 = scalar_lea.vmem %s2276_s20, 32  ;;  %p2894_p11 = scmp.lt.s32.totalorder %s2276_s20, %s2276_s20 }
  0x2a   :  { %2468 = vmatpush3.bf16.msra.mxu0 %v2716_v23 }
  0x2b   :  { %2469 = vmatprep.subr.bf16.mxu0 %v2920_v1 }
  0x2c   :  { %2458 = vmatpush3.bf16.msra.mxu1 %v2704_v8 }
  0x2d   :  { %239 = vmatprep.subr.bf16.mxu1 %v2707_v9 }
  0x2e   :  { %2470 = vmatpush3.bf16.msra.mxu0 %v2720_v26 }
  0x2f   :  { %2487 = vmatprep.subr.bf16.mxu0 %v2920_v1 }
  0x9a   :  { %v53_v13 = vpop.permute.xlu0 %52 }
  0x9b   :  { %vm57_vm1 = vcmp.eq.s32.totalorder %v53_v13, %v50_v12 }
  0x9c   :  { %v59_v15 = vsel %vm57_vm1, 1.0, %v2920_v1 }
  0x9e   :  { %v56_v14 = vpop.permute.xlu0 %55 }
  0x9f   :  { %vm58_vm2 = vcmp.eq.s32.totalorder %v56_v14, %v50_v12 }
  0xa0   :  { %v60_v16 = vsel %vm58_vm2, 1.0, %v2920_v1 }
  0xa1   :  { %v61_v18 = vpack.c.bf16 %v60_v16, %v59_v15 }
  0xa3   :  { %2460 = vmatmul.mubr.msk.bf16.vlgmr.msra.gmra.mxu1 %vm96_vm3, %v61_v18 }
  0xa4   :  { %240 = vmatpush1.bf16.msra.mxu1 %v2705_v17  ;;  %263 = vmatprep.mubr.bf16.mxu1 %v2919_v0 }
  0xa5   :  { %241 = vmatprep.subr.bf16.mxu1 %v2711_v19 }
  0xa8   :  { %242 = vmatpush1.bf16.msra.mxu1 %v2709_v20 }
  0xa9   :  { %243 = vmatprep.subr.bf16.mxu1 %v2715_v21 }
  0xac   :  { %244 = vmatpush1.bf16.msra.mxu1 %v2713_v22 }
  0xad   :  { %245 = vmatprep.subr.bf16.mxu1 %v2719_v24 }
  0xb0   :  { %246 = vmatpush1.bf16.msra.mxu1 %v2717_v25 }
  0xb1   :  { %2475 = vmatprep.subr.bf16.mxu1 %v2920_v1 }
 0x163   :  { %v134_v27 = vpop.f32.mrf.mxu1 }
 0x164   :  { %v2998_v32 = vadd.f32 %v134_v27, %v70_v28 }
 0x165   :  { %v2461_v29 = vpop.f32.mrf.mxu1 }
 0x167   :  { %v137_v31 = vpop.f32.mrf.mxu1 }
 0x168   :  { %v3000_v33 = vadd.f32 %v137_v31, %v71_v30 }
 0x169   :  { %v2462_v34 = vpop.f32.mrf.mxu1 }
 0x16a   :  { %v147_v35 = vpack.c.bf16 %v3000_v33, %v2998_v32 }
 0x16c   :  { %2302 = vmatmul.mubr.msk.bf16.vlgmr.msra.gmra.mxu1 %vm96_vm3, %v147_v35  ;;  %2472 = vmatmul.mubr.msk.bf16.vlgmr.msra.gmra.mxu0 %vm96_vm3, %v147_v35 }
 0x16d   :  { %2477 = vmatprep.mubr.msk.bf16.mxu1 %vm2921_vm0, %v2920_v1  ;;  %2489 = vmatprep.mubr.msk.bf16.mxu0 %vm2921_vm0, %v2920_v1 }
 0x22c   :  { %v265_v36 = vpop.f32.mrf.mxu1  ;;  %v308_v37 = vpop.f32.mrf.mxu0 }
 0x22e   :  { %v267_v38 = vpop.f32.mrf.mxu1  ;;  %v2473_v39 = vpop.f32.mrf.mxu0 }
 0x230   :  { %v269_v40 = vpop.f32.mrf.mxu1  ;;  %v311_v41 = vpop.f32.mrf.mxu0 }
 0x231   :  { %v315_v46 = vpack.c.bf16 %v269_v40, %v265_v36  ;;  %v3016_v47 = vpack.c.bf16 %v311_v41, %v308_v37 }
 0x232   :  { %v271_v42 = vpop.f32.mrf.mxu1  ;;  %v2474_v43 = vpop.f32.mrf.mxu0 }
 0x233   :  { %v316_v44 = vpack.c.bf16 %v271_v42, %v267_v38 }
 0x235   :  { %559 = vrot.lane.b32.xlu0 %v316_v44, %s2922_s3  ;;  %437 = vrot.lane.b32.xlu1 %v316_v44, %s2923_s11  ;;  %v323_v45 = vsel %vm318_vm4, %v316_v44, 0 }
 0x236   :  { %2476 = vmatpush3.bf16.xpose.msra.mxu1 %v323_v45 }
 0x237   :  { %2481 = vmatprep.subr.bf16.mxu1 %v2920_v1 }
 0x239   :  { %680 = vrot.lane.b32.xlu0 %v316_v44, %s2924_s12  ;;  %434 = vrot.lane.b32.xlu1 %v315_v46, %s2923_s11 }
 0x23d   :  { %557 = vrot.lane.b32.xlu1 %v315_v46, %s2922_s3  ;;  %2478 = vmatmul.mubr.msk.bf16.vlgmr.msra.gmra.mxu1 %vm318_vm4, %v315_v46 }
 0x23e   :  { %2482 = vmatpush3.bf16.msra.mxu1 %v3016_v47  ;;  %2483 = vmatprep.mubr.msk.bf16.mxu1 %vm2921_vm0, %v2920_v1 }
 0x23f   :  { %2493 = vmatprep.subr.bf16.mxu1 %v2920_v1 }
 0x241   :  { %678 = vrot.lane.b32.xlu1 %v315_v46, %s2924_s12 }
 0x2a7   :  { %v438_v48 = vpop.permute.xlu1 %437  ;;  %v560_v50 = vpop.permute.xlu0 %559 }
 0x2a8   :  { %v443_v49 = vsel %vm318_vm4, %v438_v48, 0  ;;  %v565_v52 = vsel %vm318_vm4, %v560_v50, 0 }
 0x2a9   :  { %2488 = vmatpush3.bf16.xpose.msra.mxu0 %v443_v49 }
 0x2aa   :  { %2499 = vmatprep.subr.bf16.mxu0 %v2920_v1 }
 0x2ab   :  { %v435_v51 = vpop.permute.xlu1 %434  ;;  %v681_v53 = vpop.permute.xlu0 %680 }
 0x2ac   :  { %v686_v55 = vsel %vm318_vm4, %v681_v53, 0 }
 0x2af   :  { %v558_v54 = vpop.permute.xlu1 %557 }
 0x2b0   :  { %2490 = vmatmul.mubr.msk.bf16.vlgmr.msra.gmra.mxu0 %vm318_vm4, %v435_v51 }
 0x2b1   :  { %2500 = vmatpush3.bf16.xpose.msra.mxu0 %v565_v52  ;;  %2501 = vmatprep.mubr.msk.bf16.mxu0 %vm2921_vm0, %v2920_v1 }
 0x2b2   :  { %2511 = vmatprep.subr.bf16.mxu0 %v2920_v1 }
 0x2b3   :  { %v679_v56 = vpop.permute.xlu1 %678 }
 0x2b8   :  { %2502 = vmatmul.mubr.msk.bf16.vlgmr.msra.gmra.mxu0 %vm318_vm4, %v558_v54 }
 0x2b9   :  { %2512 = vmatpush3.bf16.xpose.msra.mxu0 %v686_v55  ;;  %2513 = vmatprep.mubr.msk.bf16.mxu0 %vm2921_vm0, %v2920_v1 }
 0x2ba   :  { %2523 = vmatprep.subr.bf16.mxu0 %v2920_v1 }
 0x2c0   :  { %2514 = vmatmul.mubr.msk.bf16.vlgmr.msra.gmra.mxu0 %vm318_vm4, %v679_v56 }
 0x2c1   :  { %2531 = vmatprep.mubr.msk.bf16.mxu0 %vm2921_vm0, %v2920_v1 }
 0x2fd   :  { %v359_v57 = vpop.f32.mrf.mxu1 }
 0x2fe   :  { %v366_v58 = vsel %vm318_vm4, %v359_v57, -inf }
 0x2ff   :  { %367 = vmax.xlane.f32.xlu0 %v366_v58  ;;  %v2479_v59 = vpop.f32.mrf.mxu1 }
 0x301   :  { %v362_v60 = vpop.f32.mrf.mxu1 }
 0x302   :  { %v369_v61 = vsel %vm318_vm4, %v362_v60, -inf }
 0x303   :  { %370 = vmax.xlane.f32.xlu1 %v369_v61  ;;  %v2480_v62 = vpop.f32.mrf.mxu1 }
 0x370   :  { %v479_v63 = vpop.f32.mrf.mxu0 }
 0x371   :  { %v486_v2 = vsel %vm318_vm4, %v479_v63, -inf }
 0x372   :  { %v2491_v3 = vpop.f32.mrf.mxu0  ;;  %487 = vmax.xlane.f32.xlu0 %v486_v2 }
 0x374   :  { %v482_v4 = vpop.f32.mrf.mxu0 }
 0x375   :  { %v489_v5 = vsel %vm318_vm4, %v482_v4, -inf }
 0x376   :  { %v2492_v6 = vpop.f32.mrf.mxu0  ;;  %490 = vmax.xlane.f32.xlu0 %v489_v5 }
 0x378   :  { %v601_v7 = vpop.f32.mrf.mxu0 }
 0x379   :  { %v608_v8 = vsel %vm318_vm4, %v601_v7, -inf }
 0x37a   :  { %v2503_v9 = vpop.f32.mrf.mxu0  ;;  %609 = vmax.xlane.f32.xlu1 %v608_v8 }
 0x37c   :  { %v604_v10 = vpop.f32.mrf.mxu0 }
 0x37d   :  { %v611_v12 = vsel %vm318_vm4, %v604_v10, -inf }
 0x37e   :  { %v2504_v13 = vpop.f32.mrf.mxu0  ;;  %612 = vmax.xlane.f32.xlu0 %v611_v12 }
 0x380   :  { %v722_v14 = vpop.f32.mrf.mxu0 }
 0x381   :  { %v729_v15 = vsel %vm318_vm4, %v722_v14, -inf }
 0x382   :  { %v2515_v16 = vpop.f32.mrf.mxu0  ;;  %730 = vmax.xlane.f32.xlu1 %v729_v15 }
 0x384   :  { %v725_v17 = vpop.f32.mrf.mxu0 }
 0x385   :  { %v732_v18 = vsel %vm318_vm4, %v725_v17, -inf }
 0x386   :  { %v2516_v19 = vpop.f32.mrf.mxu0  ;;  %733 = vmax.xlane.f32.xlu0 %v732_v18 }
 0x388   :  { %v368_v20 = vpop.xlane.xlu0 %367 }
 0x389   :  { %v372_v21 = vsub.f32 %v359_v57, %v368_v20 }
 0x38b   :  { %v374_v22 = vmul.f32 1.442695, %v372_v21 }
 0x38c   :  { %v371_v23 = vpop.xlane.xlu1 %370 }
 0x38d   :  { %2761 = vpow2.f32 %v374_v22  ;;  %v373_v24 = vsub.f32 %v362_v60, %v371_v23 }
 0x38f   :  { %v376_v25 = vmul.f32 1.442695, %v373_v24 }
 0x391   :  { %2763 = vpow2.f32 %v376_v25 }
 0x39a   :  { %v2762_v26 = vpop.eup %2761 }
 0x39b   :  { %v378_v27 = vsel %vm318_vm4, %v2762_v26, 0.0 }
 0x39c   :  { %379 = vadd.xlane.f32.xlu1 %v378_v27 }
 0x39e   :  { %v2764_v28 = vpop.eup %2763 }
 0x39f   :  { %v381_v29 = vsel %vm318_vm4, %v2764_v28, 0.0 }
 0x3a0   :  { %382 = vadd.xlane.f32.xlu0 %v381_v29 }
 0x3ad   :  { %510 = vrot.lane.b32.xlu1 %v3016_v47, %s2923_s11 }
 0x3fb   :  { %v488_v30 = vpop.xlane.xlu0 %487 }
 0x3fc   :  { %v492_v31 = vsub.f32 %v479_v63, %v488_v30 }
 0x3fe   :  { %v494_v34 = vmul.f32 1.442695, %v492_v31 }
 0x3ff   :  { %v491_v35 = vpop.xlane.xlu0 %490 }
 0x400   :  { %2765 = vpow2.f32 %v494_v34  ;;  %v493_v36 = vsub.f32 %v482_v4, %v491_v35 }
 0x402   :  { %v496_v37 = vmul.f32 1.442695, %v493_v36 }
 0x403   :  { %v610_v38 = vpop.xlane.xlu1 %609 }
 0x404   :  { %2767 = vpow2.f32 %v496_v37  ;;  %v614_v39 = vsub.f32 %v601_v7, %v610_v38  ;;  %v2721_v38 = vld [vmem:[#allocation4 + $0x148] ss:$52 sps:$4 sm:$0xff]  }
 0x405   :  { %2524 = vmatpush3.bf16.msra.mxu0 %v2721_v38 }
 0x406   :  { %v616_v40 = vmul.f32 1.442695, %v614_v39  ;;  %2525 = vmatprep.subr.bf16.mxu0 %v2920_v1 }
 0x407   :  { %v613_v41 = vpop.xlane.xlu0 %612 }
 0x408   :  { %2769 = vpow2.f32 %v616_v40  ;;  %v615_v42 = vsub.f32 %v604_v10, %v613_v41  ;;  %v2722_v41 = vld [vmem:[#allocation4 + $0xe0] ss:$52 sps:$4 sm:$0xff]  }
 0x409   :  { %2526 = vmatpush3.bf16.msra.mxu0 %v2722_v41 }
 0x40a   :  { %v618_v43 = vmul.f32 1.442695, %v615_v42  ;;  %2527 = vmatprep.subr.bf16.mxu0 %v2920_v1 }
 0x40b   :  { %v731_v44 = vpop.xlane.xlu1 %730 }
 0x40c   :  { %2771 = vpow2.f32 %v618_v43  ;;  %v735_v45 = vsub.f32 %v722_v14, %v731_v44  ;;  %v2723_v44 = vld [vmem:[#allocation4 + $0x78] ss:$52 sps:$4 sm:$0xff]  }
 0x40d   :  { %v2766_v46 = vpop.eup %2765  ;;  %2528 = vmatpush3.bf16.msra.mxu0 %v2723_v44 }
 0x40e   :  { %v737_v48 = vmul.f32 1.442695, %v735_v45  ;;  %v498_v49 = vsel %vm318_vm4, %v2766_v46, 0.0  ;;  %2529 = vmatprep.subr.bf16.mxu0 %v2920_v1 }
 0x40f   :  { %v734_v50 = vpop.xlane.xlu0 %733  ;;  %499 = vadd.xlane.f32.xlu1 %v498_v49  ;;  %v2724_v49 = vld [vmem:[#allocation4 + $0x10] ss:$52 sps:$4 sm:$0xff]  }
 0x410   :  { %2773 = vpow2.f32 %v737_v48  ;;  %v736_v51 = vsub.f32 %v725_v17, %v734_v50 }
 0x411   :  { %v2768_v52 = vpop.eup %2767  ;;  %2530 = vmatpush3.bf16.msra.mxu0 %v2724_v49 }
 0x412   :  { %v739_v53 = vmul.f32 1.442695, %v736_v51  ;;  %v501_v54 = vsel %vm318_vm4, %v2768_v52, 0.0  ;;  %2547 = vmatprep.subr.bf16.mxu0 %v2920_v1 }
 0x413   :  { %502 = vadd.xlane.f32.xlu0 %v501_v54 }
 0x414   :  { %2775 = vpow2.f32 %v739_v53 }
 0x415   :  { %v2770_v55 = vpop.eup %2769 }
 0x416   :  { %v620_v56 = vsel %vm318_vm4, %v2770_v55, 0.0 }
 0x417   :  { %621 = vadd.xlane.f32.xlu1 %v620_v56 }
 0x419   :  { %v2772_v57 = vpop.eup %2771 }
 0x41a   :  { %v623_v58 = vsel %vm318_vm4, %v2772_v57, 0.0 }
 0x41b   :  { %624 = vadd.xlane.f32.xlu0 %v623_v58 }
 0x41d   :  { %v2774_v59 = vpop.eup %2773 }
 0x41e   :  { %v741_v60 = vsel %vm318_vm4, %v2774_v59, 0.0 }
 0x41f   :  { %742 = vadd.xlane.f32.xlu1 %v741_v60 }
 0x421   :  { %v2776_v61 = vpop.eup %2775 }
 0x422   :  { %v744_v62 = vsel %vm318_vm4, %v2776_v61, 0.0 }
 0x423   :  { %745 = vadd.xlane.f32.xlu0 %v744_v62 }
 0x425   :  { %v380_v63 = vpop.xlane.xlu1 %379 }
 0x426   :  { %2777 = vrcp.f32 %v380_v63 }
 0x429   :  { %v383_v2 = vpop.xlane.xlu0 %382  ;;  %v511_v8 = vpop.permute.xlu1 %510 }
 0x42a   :  { %2779 = vrcp.f32 %v383_v2 }
 0x430   :  { %752 = vrot.lane.b32.xlu1 %v3016_v47, %s2924_s12 }
 0x433   :  { %v2778_v3 = vpop.eup %2777 }
 0x434   :  { %v386_v5 = vmul.f32 %v2778_v3, %v2762_v26 }
 0x437   :  { %v2780_v4 = vpop.eup %2779 }
 0x438   :  { %v387_v6 = vmul.f32 %v2780_v4, %v2764_v28 }
 0x439   :  { %631 = vrot.lane.b32.xlu0 %v3016_v47, %s2922_s3 }
 0x43a   :  { %v388_v7 = vpack.c.bf16 %v387_v6, %v386_v5 }
 0x43c   :  { %2484 = vmatmul.mubr.msk.bf16.vlgmr.msra.gmra.mxu1 %vm318_vm4, %v388_v7 }
 0x43d   :  { %2494 = vmatpush3.bf16.msra.mxu1 %v511_v8  ;;  %2495 = vmatprep.mubr.msk.bf16.mxu1 %vm2921_vm0, %v2920_v1 }
 0x43e   :  { %2505 = vmatprep.subr.bf16.mxu1 %v2920_v1 }
 0x498   :  { %v500_v9 = vpop.xlane.xlu1 %499 }
 0x499   :  { %2781 = vrcp.f32 %v500_v9 }
 0x49c   :  { %v503_v10 = vpop.xlane.xlu0 %502 }
 0x49d   :  { %2783 = vrcp.f32 %v503_v10 }
 0x4a0   :  { %v622_v12 = vpop.xlane.xlu1 %621 }
 0x4a1   :  { %2785 = vrcp.f32 %v622_v12 }
 0x4a4   :  { %v625_v13 = vpop.xlane.xlu0 %624 }
 0x4a5   :  { %2787 = vrcp.f32 %v625_v13 }
 0x4a6   :  { %v2782_v14 = vpop.eup %2781 }
 0x4a7   :  { %v506_v16 = vmul.f32 %v2782_v14, %v2766_v46 }
 0x4a8   :  { %v743_v47 = vpop.xlane.xlu1 %742 }
 0x4a9   :  { %2789 = vrcp.f32 %v743_v47 }
 0x4aa   :  { %v2784_v15 = vpop.eup %2783 }
 0x4ab   :  { %v507_v17 = vmul.f32 %v2784_v15, %v2768_v52 }
 0x4ac   :  { %v746_v18 = vpop.xlane.xlu0 %745  ;;  %v753_v26 = vpop.permute.xlu1 %752 }
 0x4ad   :  { %2791 = vrcp.f32 %v746_v18  ;;  %v508_v19 = vpack.c.bf16 %v507_v17, %v506_v16 }
 0x4ae   :  { %v2786_v20 = vpop.eup %2785 }
 0x4af   :  { %2496 = vmatmul.mubr.msk.bf16.vlgmr.msra.gmra.mxu1 %vm318_vm4, %v508_v19  ;;  %v628_v23 = vmul.f32 %v2786_v20, %v2770_v55 }
 0x4b0   :  { %v632_v21 = vpop.permute.xlu0 %631  ;;  %2507 = vmatprep.mubr.msk.bf16.mxu1 %vm2921_vm0, %v2920_v1 }
 0x4b1   :  { %2506 = vmatpush3.bf16.msra.mxu1 %v632_v21 }
 0x4b2   :  { %v2788_v22 = vpop.eup %2787  ;;  %2517 = vmatprep.subr.bf16.mxu1 %v2920_v1 }
 0x4b3   :  { %v629_v24 = vmul.f32 %v2788_v22, %v2772_v57 }
 0x4b5   :  { %v630_v25 = vpack.c.bf16 %v629_v24, %v628_v23  ;;  %v2726_v24 = vld [vmem:[#allocation4 + $0xe4] ss:$52 sps:$4 sm:$0xff]  }
 0x4b6   :  { %v2790_v27 = vpop.eup %2789 }
 0x4b7   :  { %2508 = vmatmul.mubr.msk.bf16.vlgmr.msra.gmra.mxu1 %vm318_vm4, %v630_v25  ;;  %v749_v29 = vmul.f32 %v2790_v27, %v2774_v59  ;;  %v2728_v25 = vld [vmem:[#allocation4 + $0x14] ss:$52 sps:$4 sm:$0xff]  }
 0x4b8   :  { %2518 = vmatpush3.bf16.msra.mxu1 %v753_v26  ;;  %2519 = vmatprep.mubr.msk.bf16.mxu1 %vm2921_vm0, %v2920_v1 }
 0x4b9   :  { %2535 = vmatprep.subr.bf16.mxu1 %v2920_v1 }
 0x4ba   :  { %v2792_v28 = vpop.eup %2791 }
 0x4bb   :  { %v750_v30 = vmul.f32 %v2792_v28, %v2776_v61 }
 0x4bd   :  { %v751_v31 = vpack.c.bf16 %v750_v30, %v749_v29 }
 0x4bf   :  { %2520 = vmatmul.mubr.msk.bf16.vlgmr.msra.gmra.mxu1 %vm318_vm4, %v751_v31 }
 0x4c0   :  { %2543 = vmatprep.mubr.msk.bf16.mxu1 %vm2921_vm0, %v2920_v1 }
 0x4fc   :  { %v426_v34 = vpop.f32.mrf.mxu1 }
 0x4fe   :  { %v2485_v35 = vpop.f32.mrf.mxu1 }
 0x500   :  { %v429_v36 = vpop.f32.mrf.mxu1 }
 0x502   :  { %v2486_v37 = vpop.f32.mrf.mxu1 }
 0x56f   :  { %v550_v39 = vpop.f32.mrf.mxu1 }
 0x571   :  { %v2497_v40 = vpop.f32.mrf.mxu1 }
 0x573   :  { %v553_v42 = vpop.f32.mrf.mxu1 }
 0x574   :  { %v2671_v43 = vpack.i.bf16 %v553_v42, %v550_v39 }
 0x575   :  { %v2498_v45 = vpop.f32.mrf.mxu1 }
 0x576   :  { %2672 = vrot.lane.b32.xlu1 %v2671_v43, %s2925_s13  ;;  %v2317_v45 = vld [vmem:[#allocation7] ss:$0 sm:$0xff] }
 0x577   :  { %v671_v46 = vpop.f32.mrf.mxu1 }
 0x579   :  { %v2509_v48 = vpop.f32.mrf.mxu1 }
 0x57b   :  { %v674_v50 = vpop.f32.mrf.mxu1 }
 0x57c   :  { %v2676_v51 = vpack.i.bf16 %v674_v50, %v671_v46 }
 0x57d   :  { %v2510_v52 = vpop.f32.mrf.mxu1 }
 0x57e   :  { %2677 = vrot.lane.b32.xlu0 %v2676_v51, %s2926_s14  ;;  %v2318_v51 = vld [vmem:[#allocation7 + $0x1] ss:$0 sm:$0xff] }
 0x57f   :  { %v792_v53 = vpop.f32.mrf.mxu1 }
 0x581   :  { %v2521_v54 = vpop.f32.mrf.mxu1 }
 0x583   :  { %v795_v55 = vpop.f32.mrf.mxu1 }
 0x584   :  { %v2681_v56 = vpack.i.bf16 %v795_v55, %v792_v53 }
 0x585   :  { %v2522_v57 = vpop.f32.mrf.mxu1 }
 0x586   :  { %2682 = vrot.lane.b32.xlu1 %v2681_v56, %s2927_s15  ;;  %v2729_v56 = vld [vmem:[#allocation4 + $0x150] ss:$52 sps:$4 sm:$0xff]   ;;  %v2730_v57 = vld [vmem:[#allocation4 + $0xe8] ss:$52 sps:$4 sm:$0xff]  }
 0x5e8   :  { %v2673_v58 = vpop.permute.xlu1 %2672 }
 0x5e9   :  { %v2675_v60 = vunpack.i.h.bf16 %v2673_v58  ;;  %v2674_v61 = vunpack.i.l.bf16 %v2673_v58  ;;  %v2731_v58 = vld [vmem:[#allocation4 + $0x80] ss:$52 sps:$4 sm:$0xff]  }
 0x5eb   :  { %v824_v3 = vsel %vm318_vm4, %v429_v36, %v2675_v60  ;;  %v823_v4 = vsel %vm318_vm4, %v426_v34, %v2674_v61  ;;  %v2319_v60 = vld [vmem:[#allocation7 + $0x2] ss:$0 sm:$0xff] }
 0x5f0   :  { %v2678_v59 = vpop.permute.xlu0 %2677 }
 0x5f1   :  { %v2680_v62 = vunpack.i.h.bf16 %v2678_v59  ;;  %v2679_v63 = vunpack.i.l.bf16 %v2678_v59  ;;  %v2732_v59 = vld [vmem:[#allocation4 + $0x18] ss:$52 sps:$4 sm:$0xff]  }
 0x5f3   :  { %v827_v7 = vsel %vm825_vm5, %v824_v3, %v2680_v62  ;;  %v826_v8 = vsel %vm825_vm5, %v823_v4, %v2679_v63 }
 0x5f8   :  { %v2683_v2 = vpop.permute.xlu1 %2682 }
 0x5f9   :  { %v2685_v5 = vunpack.i.h.bf16 %v2683_v2  ;;  %v2684_v6 = vunpack.i.l.bf16 %v2683_v2 }
 0x5fb   :  { %v830_v9 = vsel %vm828_vm6, %v827_v7, %v2685_v5  ;;  %v829_v10 = vsel %vm828_vm6, %v826_v8, %v2684_v6 }
 0x5fc   :  { %v831_v12 = vpack.c.bf16 %v830_v9, %v829_v10 }
 0x5fe   :  { %2532 = vmatmul.mubr.msk.bf16.vlgmr.msra.gmra.mxu0 %vm96_vm3, %v831_v12 }
 0x5ff   :  { %2555 = vmatprep.mubr.msk.bf16.mxu0 %vm2921_vm0, %v2920_v1  ;;  %2548 = vmatpush3.bf16.xpose.msra.mxu0 %v2729_v56 }
 0x600   :  { %2549 = vmatprep.subr.bf16.mxu0 %v2920_v1 }
 0x607   :  { %2550 = vmatpush3.bf16.xpose.msra.mxu0 %v2730_v57 }
 0x608   :  { %2551 = vmatprep.subr.bf16.mxu0 %v2920_v1 }
 0x60f   :  { %2552 = vmatpush3.bf16.xpose.msra.mxu0 %v2731_v58 }
 0x610   :  { %2553 = vmatprep.subr.bf16.mxu0 %v2920_v1 }
 0x617   :  { %2554 = vmatpush3.bf16.xpose.msra.mxu0 %v2732_v59 }
 0x618   :  { %2571 = vmatprep.subr.bf16.mxu0 %v2920_v1 }
 0x6be   :  { %v901_v13 = vpop.f32.mrf.mxu0 }
 0x6bf   :  { %v908_v14 = vadd.f32 %v901_v13, %v2998_v32  ;;  %v2725_v32 = vld [vmem:[#allocation4 + $0x14c] ss:$52 sps:$4 sm:$0xff]  }
 0x6c0   :  { %v2533_v47 = vpop.f32.mrf.mxu0  ;;  %2536 = vmatpush3.bf16.msra.mxu1 %v2725_v32 }
 0x6c1   :  { %v910_v15 = vsel %vm96_vm3, %v908_v14, 0.0  ;;  %v919_v16 = vmul.f32 %v908_v14, %v908_v14  ;;  %2537 = vmatprep.subr.bf16.mxu1 %v2920_v1 }
 0x6c2   :  { %911 = vadd.xlane.f32.xlu0 %v910_v15  ;;  %v904_v17 = vpop.f32.mrf.mxu0 }
 0x6c3   :  { %v909_v18 = vadd.f32 %v904_v17, %v3000_v33  ;;  %v921_v20 = vsel %vm96_vm3, %v919_v16, 0.0  ;;  %v2727_v33 = vld [vmem:[#allocation4 + $0x7c] ss:$52 sps:$4 sm:$0xff]  }
 0x6c4   :  { %v2534_v19 = vpop.f32.mrf.mxu0  ;;  %2538 = vmatpush3.bf16.msra.mxu1 %v2726_v24 }
 0x6c5   :  { %v913_v21 = vsel %vm96_vm3, %v909_v18, 0.0  ;;  %v920_v22 = vmul.f32 %v909_v18, %v909_v18  ;;  %2539 = vmatprep.subr.bf16.mxu1 %v2920_v1 }
 0x6c6   :  { %922 = vadd.xlane.f32.xlu0 %v921_v20  ;;  %914 = vadd.xlane.f32.xlu1 %v913_v21 }
 0x6c7   :  { %v924_v23 = vsel %vm96_vm3, %v920_v22, 0.0 }
 0x6c8   :  { %2540 = vmatpush3.bf16.msra.mxu1 %v2727_v33 }
 0x6c9   :  { %2541 = vmatprep.subr.bf16.mxu1 %v2920_v1 }
 0x6ca   :  { %925 = vadd.xlane.f32.xlu0 %v924_v23  ;;  %v2325_v23 = vld [vmem:[#allocation7 + $0x3] ss:$0 sm:$0xff] }
 0x6cc   :  { %2542 = vmatpush3.bf16.msra.mxu1 %v2728_v25 }
 0x74b   :  { %v912_v26 = vpop.xlane.xlu0 %911 }
 0x74c   :  { %v917_v27 = vmul.f32 0.015625, %v912_v26 }
 0x74e   :  { %v929_v30 = vmul.f32 %v917_v27, %v917_v27  ;;  %v933_v42 = vsub.f32 %v908_v14, %v917_v27 }
 0x74f   :  { %v923_v28 = vpop.xlane.xlu0 %922  ;;  %v915_v29 = vpop.xlane.xlu1 %914 }
 0x750   :  { %v927_v31 = vmul.f32 0.015625, %v923_v28  ;;  %v918_v34 = vmul.f32 0.015625, %v915_v29 }
 0x752   :  { %v931_v35 = vsub.f32 %v927_v31, %v929_v30  ;;  %v930_v38 = vmul.f32 %v918_v34, %v918_v34  ;;  %v934_v46 = vsub.f32 %v909_v18, %v918_v34 }
 0x753   :  { %v926_v36 = vpop.xlane.xlu0 %925 }
 0x754   :  { %v935_v37 = vadd.f32 1e-05, %v931_v35  ;;  %v928_v39 = vmul.f32 0.015625, %v926_v36 }
 0x756   :  { %2793 = vrsqrt.f32 %v935_v37  ;;  %v932_v40 = vsub.f32 %v928_v39, %v930_v38  ;;  %v2735_v38 = vld [vmem:[#allocation4 + $0x158] ss:$52 sps:$4 sm:$0xff]   ;;  %v2733_v39 = vld [vmem:[#allocation4 + $0x154] ss:$52 sps:$4 sm:$0xff]  }
 0x757   :  { %1284 = vmatprep.subr.bf16.mxu1 %v2735_v38 }
 0x758   :  { %v936_v41 = vadd.f32 1e-05, %v932_v40  ;;  %v2738_v40 = vld [vmem:[#allocation4 + $0xf0] ss:$52 sps:$4 sm:$0xff]  }
 0x75a   :  { %2795 = vrsqrt.f32 %v936_v41  ;;  %v2736_v41 = vld [vmem:[#allocation4 + $0xec] ss:$52 sps:$4 sm:$0xff]  }
 0x763   :  { %v2794_v43 = vpop.eup %2793 }
 0x764   :  { %v939_v44 = vmul.f32 %v2794_v43, %v933_v42  ;;  %v2741_v42 = vld [vmem:[#allocation4 + $0x88] ss:$52 sps:$4 sm:$0xff]   ;;  %v2739_v43 = vld [vmem:[#allocation4 + $0x84] ss:$52 sps:$4 sm:$0xff]  }
 0x766   :  { %v947_v50 = vmul.f32 %v2317_v45, %v939_v44  ;;  %v2744_v44 = vld [vmem:[#allocation4 + $0x20] ss:$52 sps:$4 sm:$0xff]  }
 0x767   :  { %v2796_v48 = vpop.eup %2795 }
 0x768   :  { %v940_v49 = vmul.f32 %v2796_v48, %v934_v46  ;;  %v955_v53 = vadd.f32 %v2318_v51, %v947_v50 }
 0x76a   :  { %v948_v52 = vmul.f32 %v2317_v45, %v940_v49  ;;  %v2742_v45 = vld [vmem:[#allocation4 + $0x1c] ss:$52 sps:$4 sm:$0xff]  }
 0x76c   :  { %v956_v54 = vadd.f32 %v2318_v51, %v948_v52 }
 0x76e   :  { %v973_v55 = vpack.c.bf16 %v956_v54, %v955_v53 }
 0x770   :  { %2544 = vmatmul.mubr.msk.bf16.vlgmr.msra.gmra.mxu1 %vm96_vm3, %v973_v55 }
 0x771   :  { %1308 = vmatprep.mubr.bf16.mxu1 %v2919_v0  ;;  %1285 = vmatpush1.bf16.msra.mxu1 %v2733_v39 }
 0x772   :  { %1286 = vmatprep.subr.bf16.mxu1 %v2738_v40 }
 0x775   :  { %1287 = vmatpush1.bf16.msra.mxu1 %v2736_v41 }
 0x776   :  { %1288 = vmatprep.subr.bf16.mxu1 %v2741_v42 }
 0x779   :  { %1289 = vmatpush1.bf16.msra.mxu1 %v2739_v43 }
 0x77a   :  { %1290 = vmatprep.subr.bf16.mxu1 %v2744_v44 }
 0x77d   :  { %1291 = vmatpush1.bf16.msra.mxu1 %v2742_v45 }
 0x77e   :  { %2559 = vmatprep.subr.bf16.mxu1 %v2920_v1 }
 0x830   :  { %v1041_v61 = vpop.f32.mrf.mxu1 }
 0x831   :  { %v1042_v62 = vadd.f32 %v2319_v60, %v1041_v61 }
 0x832   :  { %v2545_v0 = vpop.f32.mrf.mxu1 }
 0x833   :  { %v1048_v63 = vmul.f32 %v1042_v62, %v1042_v62 }
 0x834   :  { %v1044_v2 = vpop.f32.mrf.mxu1 }
 0x835   :  { %v1050_v3 = vmul.f32 %v1048_v63, %v1042_v62  ;;  %v1045_v4 = vadd.f32 %v2319_v60, %v1044_v2  ;;  %v2330_v63 = vld [vmem:[#allocation7 + $0x4] ss:$0 sm:$0xff] }
 0x836   :  { %v2546_v5 = vpop.f32.mrf.mxu1 }
 0x837   :  { %v1052_v6 = vmul.f32 0.044715, %v1050_v3  ;;  %v1049_v7 = vmul.f32 %v1045_v4, %v1045_v4 }
 0x839   :  { %v1054_v8 = vadd.f32 %v1052_v6, %v1042_v62  ;;  %v1051_v9 = vmul.f32 %v1049_v7, %v1045_v4  ;;  %v2331_v6 = vld [vmem:[#allocation7 + $0x5] ss:$0 sm:$0xff] }
 0x83b   :  { %v1056_v10 = vmul.f32 0.7978846, %v1054_v8  ;;  %v1053_v12 = vmul.f32 0.044715, %v1051_v9 }
 0x83d   :  { %2797 = vtanh.f32 %v1056_v10  ;;  %v1055_v13 = vadd.f32 %v1053_v12, %v1045_v4  ;;  %v2745_v10 = vld [vmem:[#allocation4 + $0x15c] ss:$52 sps:$4 sm:$0xff]  }
 0x83f   :  { %v1057_v14 = vmul.f32 0.7978846, %v1055_v13  ;;  %v2746_v13 = vld [vmem:[#allocation4 + $0xf4] ss:$52 sps:$4 sm:$0xff]  }
 0x841   :  { %2799 = vtanh.f32 %v1057_v14  ;;  %v2747_v14 = vld [vmem:[#allocation4 + $0x8c] ss:$52 sps:$4 sm:$0xff]  }
 0x84a   :  { %v2798_v47 = vpop.eup %2797 }
 0x84b   :  { %v1060_v15 = vadd.f32 1.0, %v2798_v47  ;;  %v2748_v47 = vld [vmem:[#allocation4 + $0x24] ss:$52 sps:$4 sm:$0xff]  }
 0x84d   :  { %v1062_v17 = vmul.f32 0.5, %v1060_v15 }
 0x84e   :  { %v2800_v16 = vpop.eup %2799 }
 0x84f   :  { %v1061_v18 = vadd.f32 1.0, %v2800_v16  ;;  %v1064_v20 = vmul.f32 %v1062_v17, %v1042_v62 }
 0x851   :  { %v1063_v19 = vmul.f32 0.5, %v1061_v18 }
 0x853   :  { %v1065_v21 = vmul.f32 %v1063_v19, %v1045_v4 }
 0x855   :  { %v1066_v22 = vpack.c.bf16 %v1065_v21, %v1064_v20 }
 0x857   :  { %2556 = vmatmul.mubr.bf16.vlgmr.msra.gmra.mxu0 %v1066_v22 }
 0x858   :  { %2573 = vmatprep.mubr.msk.bf16.mxu0 %vm2921_vm0, %v2920_v1 }
 0x917   :  { %v1131_v32 = vpop.f32.mrf.mxu0 }
 0x918   :  { %v1132_v24 = vadd.f32 %v2325_v23, %v1131_v32 }
 0x919   :  { %v2557_v33 = vpop.f32.mrf.mxu0 }
 0x91a   :  { %v1138_v25 = vadd.f32 %v1132_v24, %v955_v53 }
 0x91b   :  { %v1134_v26 = vpop.f32.mrf.mxu0 }
 0x91c   :  { %v1135_v27 = vadd.f32 %v2325_v23, %v1134_v26  ;;  %v1140_v28 = vsel %vm96_vm3, %v1138_v25, 0.0  ;;  %v1148_v29 = vmul.f32 %v1138_v25, %v1138_v25 }
 0x91d   :  { %1141 = vadd.xlane.f32.xlu1 %v1140_v28  ;;  %v2558_v30 = vpop.f32.mrf.mxu0 }
 0x91e   :  { %v1139_v31 = vadd.f32 %v1135_v27, %v956_v54  ;;  %v1150_v34 = vsel %vm96_vm3, %v1148_v29, 0.0 }
 0x920   :  { %v1143_v35 = vsel %vm96_vm3, %v1139_v31, 0.0  ;;  %v1149_v36 = vmul.f32 %v1139_v31, %v1139_v31 }
 0x921   :  { %1151 = vadd.xlane.f32.xlu1 %v1150_v34  ;;  %1144 = vadd.xlane.f32.xlu0 %v1143_v35 }
 0x922   :  { %v1153_v37 = vsel %vm96_vm3, %v1149_v36, 0.0 }
 0x925   :  { %1154 = vadd.xlane.f32.xlu0 %v1153_v37 }
 0x9a6   :  { %v1142_v46 = vpop.xlane.xlu1 %1141 }
 0x9a7   :  { %v1146_v48 = vmul.f32 0.015625, %v1142_v46 }
 0x9a9   :  { %v1158_v51 = vmul.f32 %v1146_v48, %v1146_v48  ;;  %v1162_v61 = vsub.f32 %v1138_v25, %v1146_v48 }
 0x9aa   :  { %v1152_v49 = vpop.xlane.xlu1 %1151  ;;  %v1145_v50 = vpop.xlane.xlu0 %1144 }
 0x9ab   :  { %v1156_v52 = vmul.f32 0.015625, %v1152_v49  ;;  %v1147_v53 = vmul.f32 0.015625, %v1145_v50 }
 0x9ad   :  { %v1160_v54 = vsub.f32 %v1156_v52, %v1158_v51  ;;  %v1159_v57 = vmul.f32 %v1147_v53, %v1147_v53  ;;  %v1163_v2 = vsub.f32 %v1139_v31, %v1147_v53 }
 0x9ae   :  { %v1155_v55 = vpop.xlane.xlu0 %1154 }
 0x9af   :  { %v1164_v56 = vadd.f32 1e-05, %v1160_v54  ;;  %v1157_v58 = vmul.f32 0.015625, %v1155_v55 }
 0x9b1   :  { %2801 = vrsqrt.f32 %v1164_v56  ;;  %v1161_v59 = vsub.f32 %v1157_v58, %v1159_v57 }
 0x9b3   :  { %v1165_v60 = vadd.f32 1e-05, %v1161_v59 }
 0x9b5   :  { %2803 = vrsqrt.f32 %v1165_v60 }
 0x9be   :  { %v2802_v62 = vpop.eup %2801 }
 0x9bf   :  { %v1168_v0 = vmul.f32 %v2802_v62, %v1162_v61 }
 0x9c1   :  { %v1176_v5 = vmul.f32 %v2330_v63, %v1168_v0 }
 0x9c2   :  { %v2804_v3 = vpop.eup %2803 }
 0x9c3   :  { %v1169_v4 = vmul.f32 %v2804_v3, %v1163_v2  ;;  %v3115_v8 = vadd.f32 %v2331_v6, %v1176_v5 }
 0x9c5   :  { %v1177_v7 = vmul.f32 %v2330_v63, %v1169_v4 }
 0x9c7   :  { %v3117_v9 = vadd.f32 %v2331_v6, %v1177_v7 }
 0x9c9   :  { %v1192_v12 = vpack.c.bf16 %v3117_v9, %v3115_v8 }
 0x9cb   :  { %2344 = vmatmul.mubr.msk.bf16.vlgmr.msra.gmra.mxu1 %vm96_vm3, %v1192_v12 }
 0x9cc   :  { %2560 = vmatpush3.bf16.msra.mxu1 %v2745_v10  ;;  %2567 = vmatprep.mubr.msk.bf16.mxu1 %vm2921_vm0, %v2920_v1 }
 0x9cd   :  { %2561 = vmatprep.subr.bf16.mxu1 %v2920_v1 }
 0x9d0   :  { %2562 = vmatpush3.bf16.msra.mxu1 %v2746_v13 }
 0x9d1   :  { %2563 = vmatprep.subr.bf16.mxu1 %v2920_v1 }
 0x9d4   :  { %2564 = vmatpush3.bf16.msra.mxu1 %v2747_v14 }
 0x9d5   :  { %2565 = vmatprep.subr.bf16.mxu1 %v2920_v1 }
 0x9d8   :  { %2566 = vmatpush3.bf16.msra.mxu1 %v2748_v47 }
 0x9d9   :  { %2577 = vmatprep.subr.bf16.mxu1 %v2920_v1 }
 0x9db   :  { %2568 = vmatmul.mubr.msk.bf16.vlgmr.msra.gmra.mxu1 %vm96_vm3, %v1192_v12 }
 0x9dc   :  { %2579 = vmatprep.mubr.msk.bf16.mxu1 %vm2921_vm0, %v2920_v1 }
 0xa8b   :  { %v1310_v15 = vpop.f32.mrf.mxu1 }
 0xa8d   :  { %v1312_v16 = vpop.f32.mrf.mxu1 }
 0xa8f   :  { %v1314_v17 = vpop.f32.mrf.mxu1 }
 0xa90   :  { %v1360_v18 = vpack.c.bf16 %v1314_v17, %v1310_v15 }
 0xa91   :  { %v1316_v19 = vpop.f32.mrf.mxu1 }
 0xa92   :  { %v1361_v20 = vpack.c.bf16 %v1316_v19, %v1312_v16  ;;  %1478 = vrot.lane.b32.xlu0 %v1360_v18, %s2923_s11 }
 0xa94   :  { %1481 = vrot.lane.b32.xlu1 %v1361_v20, %s2923_s11  ;;  %v1367_v21 = vsel %vm318_vm4, %v1361_v20, 0 }
 0xa95   :  { %2572 = vmatpush3.bf16.xpose.msra.mxu0 %v1367_v21 }
 0xa96   :  { %1724 = vrot.lane.b32.xlu0 %v1361_v20, %s2924_s12  ;;  %2583 = vmatprep.subr.bf16.mxu0 %v2920_v1 }
 0xa98   :  { %1603 = vrot.lane.b32.xlu1 %v1361_v20, %s2922_s3 }
 0xa9b   :  { %v1353_v22 = vpop.f32.mrf.mxu1 }
 0xa9c   :  { %1601 = vrot.lane.b32.xlu1 %v1360_v18, %s2922_s3  ;;  %2574 = vmatmul.mubr.msk.bf16.vlgmr.msra.gmra.mxu0 %vm318_vm4, %v1360_v18 }
 0xa9d   :  { %v2569_v23 = vpop.f32.mrf.mxu1  ;;  %2585 = vmatprep.mubr.msk.bf16.mxu0 %vm2921_vm0, %v2920_v1 }
 0xa9f   :  { %v1356_v32 = vpop.f32.mrf.mxu1 }
 0xaa0   :  { %v3141_v24 = vpack.c.bf16 %v1356_v32, %v1353_v22  ;;  %1722 = vrot.lane.b32.xlu1 %v1360_v18, %s2924_s12 }
 0xaa1   :  { %v2570_v33 = vpop.f32.mrf.mxu1 }
 0xaa2   :  { %2578 = vmatpush3.bf16.msra.mxu1 %v3141_v24 }
 0xaa3   :  { %2589 = vmatprep.subr.bf16.mxu1 %v2920_v1 }
 0xb04   :  { %v1479_v28 = vpop.permute.xlu0 %1478 }
 0xb06   :  { %v1482_v25 = vpop.permute.xlu1 %1481 }
 0xb07   :  { %v1487_v26 = vsel %vm318_vm4, %v1482_v25, 0 }
 0xb08   :  { %2584 = vmatpush3.bf16.xpose.msra.mxu0 %v1487_v26  ;;  %v1725_v30 = vpop.permute.xlu0 %1724 }
 0xb09   :  { %2595 = vmatprep.subr.bf16.mxu0 %v2920_v1  ;;  %v1730_v34 = vsel %vm318_vm4, %v1725_v30, 0 }
 0xb0a   :  { %v1604_v27 = vpop.permute.xlu1 %1603 }
 0xb0b   :  { %v1609_v29 = vsel %vm318_vm4, %v1604_v27, 0 }
 0xb0e   :  { %v1602_v31 = vpop.permute.xlu1 %1601 }
 0xb0f   :  { %2586 = vmatmul.mubr.msk.bf16.vlgmr.msra.gmra.mxu0 %vm318_vm4, %v1479_v28 }
 0xb10   :  { %2596 = vmatpush3.bf16.xpose.msra.mxu0 %v1609_v29  ;;  %2597 = vmatprep.mubr.msk.bf16.mxu0 %vm2921_vm0, %v2920_v1 }
 0xb11   :  { %2607 = vmatprep.subr.bf16.mxu0 %v2920_v1 }
 0xb12   :  { %v1723_v35 = vpop.permute.xlu1 %1722 }
 0xb17   :  { %2598 = vmatmul.mubr.msk.bf16.vlgmr.msra.gmra.mxu0 %vm318_vm4, %v1602_v31 }
 0xb18   :  { %2608 = vmatpush3.bf16.xpose.msra.mxu0 %v1730_v34  ;;  %2609 = vmatprep.mubr.msk.bf16.mxu0 %vm2921_vm0, %v2920_v1 }
 0xb19   :  { %2619 = vmatprep.subr.bf16.mxu0 %v2920_v1 }
 0xb1f   :  { %2610 = vmatmul.mubr.msk.bf16.vlgmr.msra.gmra.mxu0 %vm318_vm4, %v1723_v35 }
 0xb20   :  { %2627 = vmatprep.mubr.msk.bf16.mxu0 %vm2921_vm0, %v2920_v1 }
 0xb5c   :  { %v1403_v36 = vpop.f32.mrf.mxu0 }
 0xb5d   :  { %v1410_v37 = vsel %vm318_vm4, %v1403_v36, -inf }
 0xb5e   :  { %1411 = vmax.xlane.f32.xlu0 %v1410_v37  ;;  %v2575_v38 = vpop.f32.mrf.mxu0 }
 0xb60   :  { %v1406_v39 = vpop.f32.mrf.mxu0 }
 0xb61   :  { %v1413_v40 = vsel %vm318_vm4, %v1406_v39, -inf }
 0xb62   :  { %1414 = vmax.xlane.f32.xlu1 %v1413_v40  ;;  %v2576_v41 = vpop.f32.mrf.mxu0 }
 0xbcf   :  { %v1523_v42 = vpop.f32.mrf.mxu0 }
 0xbd0   :  { %v1530_v43 = vsel %vm318_vm4, %v1523_v42, -inf }
 0xbd1   :  { %1531 = vmax.xlane.f32.xlu0 %v1530_v43  ;;  %v2587_v44 = vpop.f32.mrf.mxu0 }
 0xbd3   :  { %v1526_v45 = vpop.f32.mrf.mxu0 }
 0xbd4   :  { %v1533_v46 = vsel %vm318_vm4, %v1526_v45, -inf }
 0xbd5   :  { %1534 = vmax.xlane.f32.xlu0 %v1533_v46  ;;  %v2588_v48 = vpop.f32.mrf.mxu0 }
 0xbd7   :  { %v1645_v49 = vpop.f32.mrf.mxu0 }
 0xbd8   :  { %v1652_v50 = vsel %vm318_vm4, %v1645_v49, -inf }
 0xbd9   :  { %1653 = vmax.xlane.f32.xlu1 %v1652_v50  ;;  %v2599_v51 = vpop.f32.mrf.mxu0 }
 0xbdb   :  { %v1648_v52 = vpop.f32.mrf.mxu0 }
 0xbdc   :  { %v1655_v53 = vsel %vm318_vm4, %v1648_v52, -inf }
 0xbdd   :  { %1656 = vmax.xlane.f32.xlu0 %v1655_v53  ;;  %v2600_v54 = vpop.f32.mrf.mxu0 }
 0xbdf   :  { %v1766_v55 = vpop.f32.mrf.mxu0 }
 0xbe0   :  { %v1773_v56 = vsel %vm318_vm4, %v1766_v55, -inf }
 0xbe1   :  { %1774 = vmax.xlane.f32.xlu1 %v1773_v56  ;;  %v2611_v57 = vpop.f32.mrf.mxu0 }
 0xbe3   :  { %v1769_v58 = vpop.f32.mrf.mxu0 }
 0xbe4   :  { %v1776_v59 = vsel %vm318_vm4, %v1769_v58, -inf }
 0xbe5   :  { %1777 = vmax.xlane.f32.xlu0 %v1776_v59  ;;  %v2612_v60 = vpop.f32.mrf.mxu0 }
 0xbe7   :  { %v1412_v61 = vpop.xlane.xlu0 %1411 }
 0xbe8   :  { %v1416_v62 = vsub.f32 %v1403_v36, %v1412_v61 }
 0xbea   :  { %v1418_v0 = vmul.f32 1.442695, %v1416_v62 }
 0xbeb   :  { %v1415_v63 = vpop.xlane.xlu1 %1414 }
 0xbec   :  { %2805 = vpow2.f32 %v1418_v0  ;;  %v1417_v2 = vsub.f32 %v1406_v39, %v1415_v63 }
 0xbee   :  { %v1420_v3 = vmul.f32 1.442695, %v1417_v2 }
 0xbf0   :  { %2807 = vpow2.f32 %v1420_v3 }
 0xbf9   :  { %v2806_v4 = vpop.eup %2805 }
 0xbfa   :  { %v1422_v5 = vsel %vm318_vm4, %v2806_v4, 0.0 }
 0xbfb   :  { %1423 = vadd.xlane.f32.xlu1 %v1422_v5 }
 0xbfd   :  { %v2808_v6 = vpop.eup %2807 }
 0xbfe   :  { %v1425_v7 = vsel %vm318_vm4, %v2808_v6, 0.0 }
 0xbff   :  { %1426 = vadd.xlane.f32.xlu0 %v1425_v7 }
 0xc0c   :  { %1554 = vrot.lane.b32.xlu1 %v3141_v24, %s2923_s11 }
 0xc5a   :  { %v1532_v10 = vpop.xlane.xlu0 %1531 }
 0xc5b   :  { %v1536_v12 = vsub.f32 %v1523_v42, %v1532_v10 }
 0xc5d   :  { %v1538_v13 = vmul.f32 1.442695, %v1536_v12 }
 0xc5e   :  { %v1535_v14 = vpop.xlane.xlu0 %1534 }
 0xc5f   :  { %2809 = vpow2.f32 %v1538_v13  ;;  %v1537_v47 = vsub.f32 %v1526_v45, %v1535_v14 }
 0xc61   :  { %v1540_v15 = vmul.f32 1.442695, %v1537_v47 }
 0xc62   :  { %v1654_v16 = vpop.xlane.xlu1 %1653 }
 0xc63   :  { %2811 = vpow2.f32 %v1540_v15  ;;  %v1658_v17 = vsub.f32 %v1645_v49, %v1654_v16  ;;  %v2749_v15 = vld [vmem:[#allocation4 + $0x160] ss:$52 sps:$4 sm:$0xff]  }
 0xc64   :  { %2620 = vmatpush3.bf16.msra.mxu0 %v2749_v15 }
 0xc65   :  { %v1660_v18 = vmul.f32 1.442695, %v1658_v17  ;;  %2621 = vmatprep.subr.bf16.mxu0 %v2920_v1 }
 0xc66   :  { %v1657_v19 = vpop.xlane.xlu0 %1656 }
 0xc67   :  { %2813 = vpow2.f32 %v1660_v18  ;;  %v1659_v20 = vsub.f32 %v1648_v52, %v1657_v19  ;;  %v2750_v18 = vld [vmem:[#allocation4 + $0xf8] ss:$52 sps:$4 sm:$0xff]  }
 0xc68   :  { %2622 = vmatpush3.bf16.msra.mxu0 %v2750_v18 }
 0xc69   :  { %v1662_v21 = vmul.f32 1.442695, %v1659_v20  ;;  %2623 = vmatprep.subr.bf16.mxu0 %v2920_v1 }
 0xc6a   :  { %v1775_v22 = vpop.xlane.xlu1 %1774 }
 0xc6b   :  { %2815 = vpow2.f32 %v1662_v21  ;;  %v1779_v23 = vsub.f32 %v1766_v55, %v1775_v22  ;;  %v2751_v21 = vld [vmem:[#allocation4 + $0x90] ss:$52 sps:$4 sm:$0xff]  }
 0xc6c   :  { %v2810_v32 = vpop.eup %2809  ;;  %2624 = vmatpush3.bf16.msra.mxu0 %v2751_v21  ;;  %v2359_v21 = vld [vmem:[#allocation7 + $0x6] ss:$0 sm:$0xff] }
 0xc6d   :  { %v1781_v33 = vmul.f32 1.442695, %v1779_v23  ;;  %v1542_v25 = vsel %vm318_vm4, %v2810_v32, 0.0  ;;  %2625 = vmatprep.subr.bf16.mxu0 %v2920_v1 }
 0xc6e   :  { %v1778_v26 = vpop.xlane.xlu0 %1777  ;;  %1543 = vadd.xlane.f32.xlu1 %v1542_v25 }
 0xc6f   :  { %2817 = vpow2.f32 %v1781_v33  ;;  %v1780_v27 = vsub.f32 %v1769_v58, %v1778_v26  ;;  %v2752_v33 = vld [vmem:[#allocation4 + $0x28] ss:$52 sps:$4 sm:$0xff]  }
 0xc70   :  { %v2812_v28 = vpop.eup %2811  ;;  %2626 = vmatpush3.bf16.msra.mxu0 %v2752_v33 }
 0xc71   :  { %v1783_v29 = vmul.f32 1.442695, %v1780_v27  ;;  %v1545_v30 = vsel %vm318_vm4, %v2812_v28, 0.0  ;;  %2643 = vmatprep.subr.bf16.mxu0 %v2920_v1 }
 0xc72   :  { %1546 = vadd.xlane.f32.xlu0 %v1545_v30 }
 0xc73   :  { %2819 = vpow2.f32 %v1783_v29 }
 0xc74   :  { %v2814_v31 = vpop.eup %2813 }
 0xc75   :  { %v1664_v34 = vsel %vm318_vm4, %v2814_v31, 0.0 }
 0xc76   :  { %1665 = vadd.xlane.f32.xlu1 %v1664_v34 }
 0xc78   :  { %v2816_v35 = vpop.eup %2815 }
 0xc79   :  { %v1667_v36 = vsel %vm318_vm4, %v2816_v35, 0.0 }
 0xc7a   :  { %1668 = vadd.xlane.f32.xlu0 %v1667_v36 }
 0xc7c   :  { %v2818_v37 = vpop.eup %2817 }
 0xc7d   :  { %v1785_v38 = vsel %vm318_vm4, %v2818_v37, 0.0 }
 0xc7e   :  { %1786 = vadd.xlane.f32.xlu1 %v1785_v38 }
 0xc80   :  { %v2820_v39 = vpop.eup %2819 }
 0xc81   :  { %v1788_v40 = vsel %vm318_vm4, %v2820_v39, 0.0 }
 0xc82   :  { %1789 = vadd.xlane.f32.xlu0 %v1788_v40 }
 0xc84   :  { %v1424_v41 = vpop.xlane.xlu1 %1423 }
 0xc85   :  { %2821 = vrcp.f32 %v1424_v41 }
 0xc88   :  { %v1427_v42 = vpop.xlane.xlu0 %1426  ;;  %v1555_v49 = vpop.permute.xlu1 %1554 }
 0xc89   :  { %2823 = vrcp.f32 %v1427_v42 }
 0xc8f   :  { %1796 = vrot.lane.b32.xlu1 %v3141_v24, %s2924_s12 }
 0xc92   :  { %v2822_v43 = vpop.eup %2821 }
 0xc93   :  { %v1430_v45 = vmul.f32 %v2822_v43, %v2806_v4 }
 0xc96   :  { %v2824_v44 = vpop.eup %2823 }
 0xc97   :  { %v1431_v46 = vmul.f32 %v2824_v44, %v2808_v6 }
 0xc98   :  { %1675 = vrot.lane.b32.xlu0 %v3141_v24, %s2922_s3 }
 0xc99   :  { %v1432_v48 = vpack.c.bf16 %v1431_v46, %v1430_v45 }
 0xc9b   :  { %2580 = vmatmul.mubr.msk.bf16.vlgmr.msra.gmra.mxu1 %vm318_vm4, %v1432_v48 }
 0xc9c   :  { %2590 = vmatpush3.bf16.msra.mxu1 %v1555_v49  ;;  %2591 = vmatprep.mubr.msk.bf16.mxu1 %vm2921_vm0, %v2920_v1 }
 0xc9d   :  { %2601 = vmatprep.subr.bf16.mxu1 %v2920_v1 }
 0xcf7   :  { %v1544_v50 = vpop.xlane.xlu1 %1543 }
 0xcf8   :  { %2825 = vrcp.f32 %v1544_v50 }
 0xcfb   :  { %v1547_v51 = vpop.xlane.xlu0 %1546 }
 0xcfc   :  { %2827 = vrcp.f32 %v1547_v51 }
 0xcff   :  { %v1666_v52 = vpop.xlane.xlu1 %1665 }
 0xd00   :  { %2829 = vrcp.f32 %v1666_v52 }
 0xd03   :  { %v1669_v53 = vpop.xlane.xlu0 %1668 }
 0xd04   :  { %2831 = vrcp.f32 %v1669_v53 }
 0xd05   :  { %v2826_v54 = vpop.eup %2825 }
 0xd06   :  { %v1550_v56 = vmul.f32 %v2826_v54, %v2810_v32 }
 0xd07   :  { %v1787_v24 = vpop.xlane.xlu1 %1786 }
 0xd08   :  { %2833 = vrcp.f32 %v1787_v24 }
 0xd09   :  { %v2828_v55 = vpop.eup %2827 }
 0xd0a   :  { %v1551_v57 = vmul.f32 %v2828_v55, %v2812_v28 }
 0xd0b   :  { %v1790_v58 = vpop.xlane.xlu0 %1789  ;;  %v1797_v3 = vpop.permute.xlu1 %1796 }
 0xd0c   :  { %2835 = vrcp.f32 %v1790_v58  ;;  %v1552_v59 = vpack.c.bf16 %v1551_v57, %v1550_v56 }
 0xd0d   :  { %v2830_v60 = vpop.eup %2829 }
 0xd0e   :  { %2592 = vmatmul.mubr.msk.bf16.vlgmr.msra.gmra.mxu1 %vm318_vm4, %v1552_v59  ;;  %v1672_v0 = vmul.f32 %v2830_v60, %v2814_v31 }
 0xd0f   :  { %v1676_v61 = vpop.permute.xlu0 %1675  ;;  %2603 = vmatprep.mubr.msk.bf16.mxu1 %vm2921_vm0, %v2920_v1 }
 0xd10   :  { %2602 = vmatpush3.bf16.msra.mxu1 %v1676_v61 }
 0xd11   :  { %v2832_v62 = vpop.eup %2831  ;;  %2613 = vmatprep.subr.bf16.mxu1 %v2920_v1 }
 0xd12   :  { %v1673_v63 = vmul.f32 %v2832_v62, %v2816_v35 }
 0xd14   :  { %v1674_v2 = vpack.c.bf16 %v1673_v63, %v1672_v0  ;;  %v2754_v0 = vld [vmem:[#allocation4 + $0xfc] ss:$52 sps:$4 sm:$0xff]   ;;  %v2756_v63 = vld [vmem:[#allocation4 + $0x2c] ss:$52 sps:$4 sm:$0xff]  }
 0xd15   :  { %v2834_v4 = vpop.eup %2833 }
 0xd16   :  { %2604 = vmatmul.mubr.msk.bf16.vlgmr.msra.gmra.mxu1 %vm318_vm4, %v1674_v2  ;;  %v1793_v6 = vmul.f32 %v2834_v4, %v2818_v37 }
 0xd17   :  { %2614 = vmatpush3.bf16.msra.mxu1 %v1797_v3  ;;  %2615 = vmatprep.mubr.msk.bf16.mxu1 %vm2921_vm0, %v2920_v1 }
 0xd18   :  { %2631 = vmatprep.subr.bf16.mxu1 %v2920_v1 }
 0xd19   :  { %v2836_v5 = vpop.eup %2835 }
 0xd1a   :  { %v1794_v7 = vmul.f32 %v2836_v5, %v2820_v39 }
 0xd1c   :  { %v1795_v10 = vpack.c.bf16 %v1794_v7, %v1793_v6 }
 0xd1e   :  { %2616 = vmatmul.mubr.msk.bf16.vlgmr.msra.gmra.mxu1 %vm318_vm4, %v1795_v10 }
 0xd1f   :  { %2639 = vmatprep.mubr.msk.bf16.mxu1 %vm2921_vm0, %v2920_v1 }
 0xd5b   :  { %v1470_v12 = vpop.f32.mrf.mxu1 }
 0xd5d   :  { %v2581_v13 = vpop.f32.mrf.mxu1 }
 0xd5f   :  { %v1473_v14 = vpop.f32.mrf.mxu1 }
 0xd61   :  { %v2582_v47 = vpop.f32.mrf.mxu1 }
 0xdce   :  { %v1594_v16 = vpop.f32.mrf.mxu1 }
 0xdd0   :  { %v2593_v17 = vpop.f32.mrf.mxu1 }
 0xdd2   :  { %v1597_v19 = vpop.f32.mrf.mxu1 }
 0xdd3   :  { %v2686_v20 = vpack.i.bf16 %v1597_v19, %v1594_v16 }
 0xdd4   :  { %v2594_v22 = vpop.f32.mrf.mxu1 }
 0xdd5   :  { %2687 = vrot.lane.b32.xlu1 %v2686_v20, %s2925_s13 }
 0xdd6   :  { %v1715_v23 = vpop.f32.mrf.mxu1 }
 0xdd8   :  { %v2605_v32 = vpop.f32.mrf.mxu1 }
 0xdda   :  { %v1718_v25 = vpop.f32.mrf.mxu1 }
 0xddb   :  { %v2691_v26 = vpack.i.bf16 %v1718_v25, %v1715_v23  ;;  %v2360_v25 = vld [vmem:[#allocation7 + $0x7] ss:$0 sm:$0xff] }
 0xddc   :  { %v2606_v27 = vpop.f32.mrf.mxu1 }
 0xddd   :  { %2692 = vrot.lane.b32.xlu0 %v2691_v26, %s2926_s14 }
 0xdde   :  { %v1836_v28 = vpop.f32.mrf.mxu1 }
 0xde0   :  { %v2617_v29 = vpop.f32.mrf.mxu1 }
 0xde2   :  { %v1839_v30 = vpop.f32.mrf.mxu1 }
 0xde3   :  { %v2696_v31 = vpack.i.bf16 %v1839_v30, %v1836_v28  ;;  %v2757_v30 = vld [vmem:[#allocation4 + $0x168] ss:$52 sps:$4 sm:$0xff]  }
 0xde4   :  { %v2618_v34 = vpop.f32.mrf.mxu1 }
 0xde5   :  { %2697 = vrot.lane.b32.xlu1 %v2696_v31, %s2927_s15  ;;  %v2758_v31 = vld [vmem:[#allocation4 + $0x100] ss:$52 sps:$4 sm:$0xff]   ;;  %v2759_v34 = vld [vmem:[#allocation4 + $0x98] ss:$52 sps:$4 sm:$0xff]  }
 0xe47   :  { %v2688_v35 = vpop.permute.xlu1 %2687 }
 0xe48   :  { %v2690_v37 = vunpack.i.h.bf16 %v2688_v35  ;;  %v2689_v38 = vunpack.i.l.bf16 %v2688_v35  ;;  %v2760_v35 = vld [vmem:[#allocation4 + $0x30] ss:$52 sps:$4 sm:$0xff]  }
 0xe4a   :  { %v1868_v42 = vsel %vm318_vm4, %v1473_v14, %v2690_v37  ;;  %v1867_v43 = vsel %vm318_vm4, %v1470_v12, %v2689_v38 }
 0xe4f   :  { %v2693_v36 = vpop.permute.xlu0 %2692 }
 0xe50   :  { %v2695_v39 = vunpack.i.h.bf16 %v2693_v36  ;;  %v2694_v40 = vunpack.i.l.bf16 %v2693_v36  ;;  %v2361_v36 = vld [vmem:[#allocation7 + $0x8] ss:$0 sm:$0xff] }
 0xe52   :  { %v1870_v46 = vsel %vm825_vm5, %v1868_v42, %v2695_v39  ;;  %v1869_v48 = vsel %vm825_vm5, %v1867_v43, %v2694_v40 }
 0xe57   :  { %v2698_v41 = vpop.permute.xlu1 %2697 }
 0xe58   :  { %v2700_v44 = vunpack.i.h.bf16 %v2698_v41  ;;  %v2699_v45 = vunpack.i.l.bf16 %v2698_v41 }
 0xe5a   :  { %v1872_v49 = vsel %vm828_vm6, %v1870_v46, %v2700_v44  ;;  %v1871_v50 = vsel %vm828_vm6, %v1869_v48, %v2699_v45 }
 0xe5b   :  { %v1873_v51 = vpack.c.bf16 %v1872_v49, %v1871_v50 }
 0xe5d   :  { %2628 = vmatmul.mubr.msk.bf16.vlgmr.msra.gmra.mxu0 %vm96_vm3, %v1873_v51 }
 0xe5e   :  { %2651 = vmatprep.mubr.msk.bf16.mxu0 %vm2921_vm0, %v2920_v1  ;;  %2644 = vmatpush3.bf16.xpose.msra.mxu0 %v2757_v30  ;;  %v2372_v30 = vld [vmem:[#allocation7 + $0xa] ss:$0 sm:$0xff] }
 0xe5f   :  { %2645 = vmatprep.subr.bf16.mxu0 %v2920_v1 }
 0xe66   :  { %2646 = vmatpush3.bf16.xpose.msra.mxu0 %v2758_v31  ;;  %v2227_v31 = vld [vmem:[#allocation7 + $0xc] sm:$0x1] }
 0xe67   :  { %2647 = vmatprep.subr.bf16.mxu0 %v2920_v1 }
 0xe6e   :  { %2648 = vmatpush3.bf16.xpose.msra.mxu0 %v2759_v34 }
 0xe6f   :  { %2649 = vmatprep.subr.bf16.mxu0 %v2920_v1 }
 0xe76   :  { %2650 = vmatpush3.bf16.xpose.msra.mxu0 %v2760_v35  ;;  %v2373_v35 = vld [vmem:[#allocation7 + $0xb] ss:$0 sm:$0xff] }
 0xf1d   :  { %v1943_v52 = vpop.f32.mrf.mxu0 }
 0xf1e   :  { %v1950_v53 = vadd.f32 %v1943_v52, %v3115_v8  ;;  %v2753_v8 = vld [vmem:[#allocation4 + $0x164] ss:$52 sps:$4 sm:$0xff]  }
 0xf1f   :  { %v2629_v54 = vpop.f32.mrf.mxu0  ;;  %2632 = vmatpush3.bf16.msra.mxu1 %v2753_v8 }
 0xf20   :  { %v1952_v24 = vsel %vm96_vm3, %v1950_v53, 0.0  ;;  %v1960_v55 = vmul.f32 %v1950_v53, %v1950_v53  ;;  %2633 = vmatprep.subr.bf16.mxu1 %v2920_v1 }
 0xf21   :  { %1953 = vadd.xlane.f32.xlu0 %v1952_v24  ;;  %v1946_v56 = vpop.f32.mrf.mxu0 }
 0xf22   :  { %v1951_v57 = vadd.f32 %v1946_v56, %v3117_v9  ;;  %v1962_v59 = vsel %vm96_vm3, %v1960_v55, 0.0  ;;  %v2755_v9 = vld [vmem:[#allocation4 + $0x94] ss:$52 sps:$4 sm:$0xff]  }
 0xf23   :  { %v2630_v58 = vpop.f32.mrf.mxu0  ;;  %2634 = vmatpush3.bf16.msra.mxu1 %v2754_v0 }
 0xf24   :  { %v1955_v60 = vsel %vm96_vm3, %v1951_v57, 0.0  ;;  %v1961_v61 = vmul.f32 %v1951_v57, %v1951_v57  ;;  %2635 = vmatprep.subr.bf16.mxu1 %v2920_v1 }
 0xf25   :  { %1963 = vadd.xlane.f32.xlu0 %v1962_v59  ;;  %1956 = vadd.xlane.f32.xlu1 %v1955_v60 }
 0xf26   :  { %v1965_v62 = vsel %vm96_vm3, %v1961_v61, 0.0  ;;  %v2367_v61 = vld [vmem:[#allocation7 + $0x9] ss:$0 sm:$0xff] }
 0xf27   :  { %2636 = vmatpush3.bf16.msra.mxu1 %v2755_v9 }
 0xf28   :  { %2637 = vmatprep.subr.bf16.mxu1 %v2920_v1 }
 0xf29   :  { %1966 = vadd.xlane.f32.xlu0 %v1965_v62 }
 0xf2b   :  { %2638 = vmatpush3.bf16.msra.mxu1 %v2756_v63 }
 0xfaa   :  { %v1954_v2 = vpop.xlane.xlu0 %1953 }
 0xfab   :  { %v1958_v3 = vmul.f32 0.015625, %v1954_v2 }
 0xfad   :  { %v1970_v6 = vmul.f32 %v1958_v3, %v1958_v3  ;;  %v1974_v18 = vsub.f32 %v1950_v53, %v1958_v3 }
 0xfae   :  { %v1964_v4 = vpop.xlane.xlu0 %1963  ;;  %v1957_v5 = vpop.xlane.xlu1 %1956 }
 0xfaf   :  { %v1968_v7 = vmul.f32 0.015625, %v1964_v4  ;;  %v1959_v10 = vmul.f32 0.015625, %v1957_v5 }
 0xfb1   :  { %v1972_v12 = vsub.f32 %v1968_v7, %v1970_v6  ;;  %v1971_v47 = vmul.f32 %v1959_v10, %v1959_v10  ;;  %v1975_v22 = vsub.f32 %v1951_v57, %v1959_v10 }
 0xfb2   :  { %v1967_v13 = vpop.xlane.xlu0 %1966 }
 0xfb3   :  { %v1976_v14 = vadd.f32 1e-05, %v1972_v12  ;;  %v1969_v15 = vmul.f32 0.015625, %v1967_v13 }
 0xfb5   :  { %2837 = vrsqrt.f32 %v1976_v14  ;;  %v1973_v16 = vsub.f32 %v1969_v15, %v1971_v47 }
 0xfb7   :  { %v1977_v17 = vadd.f32 1e-05, %v1973_v16 }
 0xfb9   :  { %2839 = vrsqrt.f32 %v1977_v17 }
 0xfc2   :  { %v2838_v19 = vpop.eup %2837 }
 0xfc3   :  { %v1980_v20 = vmul.f32 %v2838_v19, %v1974_v18 }
 0xfc5   :  { %v1988_v33 = vmul.f32 %v2359_v21, %v1980_v20 }
 0xfc6   :  { %v2840_v23 = vpop.eup %2839 }
 0xfc7   :  { %v1981_v32 = vmul.f32 %v2840_v23, %v1975_v22  ;;  %v1996_v27 = vadd.f32 %v2360_v25, %v1988_v33 }
 0xfc9   :  { %v1989_v26 = vmul.f32 %v2359_v21, %v1981_v32 }
 0xfcb   :  { %v1997_v28 = vadd.f32 %v2360_v25, %v1989_v26  ;;  %v2230_v26 = vshrl.u32 %v49_v11, 7 }
 0xfcd   :  { %v2014_v29 = vpack.c.bf16 %v1997_v28, %v1996_v27 }
 0xfcf   :  { %2640 = vmatmul.mubr.msk.bf16.vlgmr.msra.gmra.mxu1 %vm96_vm3, %v2014_v29 }
0x108f   :  { %v2082_v37 = vpop.f32.mrf.mxu1 }
0x1090   :  { %v2083_v38 = vadd.f32 %v2361_v36, %v2082_v37 }
0x1091   :  { %v2641_v39 = vpop.f32.mrf.mxu1 }
0x1092   :  { %v2089_v40 = vmul.f32 %v2083_v38, %v2083_v38 }
0x1093   :  { %v2085_v41 = vpop.f32.mrf.mxu1 }
0x1094   :  { %v2091_v42 = vmul.f32 %v2089_v40, %v2083_v38  ;;  %v2086_v43 = vadd.f32 %v2361_v36, %v2085_v41 }
0x1095   :  { %v2642_v44 = vpop.f32.mrf.mxu1 }
0x1096   :  { %v2093_v45 = vmul.f32 0.044715, %v2091_v42  ;;  %v2090_v46 = vmul.f32 %v2086_v43, %v2086_v43 }
0x1098   :  { %v2095_v48 = vadd.f32 %v2093_v45, %v2083_v38  ;;  %v2092_v49 = vmul.f32 %v2090_v46, %v2086_v43 }
0x109a   :  { %v2097_v50 = vmul.f32 0.7978846, %v2095_v48  ;;  %v2094_v51 = vmul.f32 0.044715, %v2092_v49  ;;  %v2245_v48 = vadd.s32 8, %v2230_v26  ;;  %v2246_v49 = vstv %s3240_s0  ;;  %s2889_s0 = scalar_lea.vmem %s2276_s20, 16 }
0x109b   :  { %vm2247_vm7 = vcmp.eq.s32.totalorder %v2230_v26, %v2246_v49  ;;  %p2890_p10 = scmp.ne.s32.totalorder %s2276_s20, %s2889_s0  ;;  %p2895_p12 = scmp.lt.s32.totalorder %s2893_s21, %s2889_s0 }
0x109c   :  { %2841 = vtanh.f32 %v2097_v50  ;;  %v2096_v52 = vadd.f32 %v2094_v51, %v2086_v43  ;;  %vm2248_vm8 = vcmp.eq.s32.totalorder %v2245_v48, %v2246_v49 }
0x109d   :  { %p2896_p13 = por %p2895_p12, %p2894_p11 }
0x109e   :  { %v2098_v1 = vmul.f32 0.7978846, %v2096_v52 }
0x109f   :  { %p2897_p0 = pnand %p2896_p13, %p2890_p10 }
0x10a0   :  { %2843 = vtanh.f32 %v2098_v1 }
0x10a9   :  { %v2842_v53 = vpop.eup %2841 }
0x10aa   :  { %v2101_v54 = vadd.f32 1.0, %v2842_v53 }
0x10ac   :  { %v2103_v55 = vmul.f32 0.5, %v2101_v54 }
0x10ad   :  { %v2844_v24 = vpop.eup %2843 }
0x10ae   :  { %v2102_v56 = vadd.f32 1.0, %v2844_v24  ;;  %v2105_v58 = vmul.f32 %v2103_v55, %v2083_v38 }
0x10b0   :  { %v2104_v57 = vmul.f32 0.5, %v2102_v56 }
0x10b2   :  { %v2106_v59 = vmul.f32 %v2104_v57, %v2086_v43 }
0x10b4   :  { %v2107_v60 = vpack.c.bf16 %v2106_v59, %v2105_v58 }
0x10b6   :  { %2652 = vmatmul.mubr.bf16.vlgmr.msra.gmra.mxu0 %v2107_v60 }
0x1176   :  { %v2172_v62 = vpop.f32.mrf.mxu0 }
0x1177   :  { %v2173_v8 = vadd.f32 %v2367_v61, %v2172_v62 }
0x1178   :  { %v2653_v0 = vpop.f32.mrf.mxu0 }
0x1179   :  { %v2179_v9 = vadd.f32 %v2173_v8, %v1996_v27 }
0x117a   :  { %v2175_v63 = vpop.f32.mrf.mxu0 }
0x117b   :  { %v2176_v2 = vadd.f32 %v2367_v61, %v2175_v63  ;;  %v2181_v3 = vsel %vm96_vm3, %v2179_v9, 0.0  ;;  %v2189_v4 = vmul.f32 %v2179_v9, %v2179_v9 }
0x117c   :  { %2182 = vadd.xlane.f32.xlu1 %v2181_v3  ;;  %v2654_v5 = vpop.f32.mrf.mxu0 }
0x117d   :  { %v2180_v6 = vadd.f32 %v2176_v2, %v1997_v28  ;;  %v2191_v7 = vsel %vm96_vm3, %v2189_v4, 0.0  ;;  %v2231_v28 = vsub.s32 0, %v2230_v26 }
0x117f   :  { %v2184_v10 = vsel %vm96_vm3, %v2180_v6, 0.0  ;;  %v2190_v12 = vmul.f32 %v2180_v6, %v2180_v6  ;;  %v2232_v38 = vrot.slane %v2227_v31, %v2231_v28 }
0x1180   :  { %2192 = vadd.xlane.f32.xlu1 %v2191_v7  ;;  %2185 = vadd.xlane.f32.xlu0 %v2184_v10 }
0x1181   :  { %v2194_v13 = vsel %vm96_vm3, %v2190_v12, 0.0 }
0x1184   :  { %2195 = vadd.xlane.f32.xlu0 %v2194_v13 }
0x1205   :  { %v2183_v14 = vpop.xlane.xlu1 %2182 }
0x1206   :  { %v2187_v47 = vmul.f32 0.015625, %v2183_v14 }
0x1208   :  { %v2199_v17 = vmul.f32 %v2187_v47, %v2187_v47  ;;  %v2203_v27 = vsub.f32 %v2179_v9, %v2187_v47 }
0x1209   :  { %v2193_v15 = vpop.xlane.xlu1 %2192  ;;  %v2186_v16 = vpop.xlane.xlu0 %2185 }
0x120a   :  { %v2197_v18 = vmul.f32 0.015625, %v2193_v15  ;;  %v2188_v19 = vmul.f32 0.015625, %v2186_v16 }
0x120c   :  { %v2201_v20 = vsub.f32 %v2197_v18, %v2199_v17  ;;  %v2200_v23 = vmul.f32 %v2188_v19, %v2188_v19  ;;  %v2204_v36 = vsub.f32 %v2180_v6, %v2188_v19 }
0x120d   :  { %v2196_v21 = vpop.xlane.xlu0 %2195 }
0x120e   :  { %v2205_v22 = vadd.f32 1e-05, %v2201_v20  ;;  %v2198_v32 = vmul.f32 0.015625, %v2196_v21 }
0x1210   :  { %2845 = vrsqrt.f32 %v2205_v22  ;;  %v2202_v33 = vsub.f32 %v2198_v32, %v2200_v23 }
0x1212   :  { %v2206_v25 = vadd.f32 1e-05, %v2202_v33 }
0x1214   :  { %2847 = vrsqrt.f32 %v2206_v25 }
0x121d   :  { %v2846_v29 = vpop.eup %2845 }
0x121e   :  { %v2209_v34 = vmul.f32 %v2846_v29, %v2203_v27 }
0x1220   :  { %v2217_v37 = vmul.f32 %v2372_v30, %v2209_v34 }
0x1221   :  { %v2848_v39 = vpop.eup %2847 }
0x1222   :  { %v2225_v40 = vadd.f32 %v2373_v35, %v2217_v37  ;;  %v2210_v41 = vmul.f32 %v2848_v39, %v2204_v36 }
0x1224   :  { %v2234_v42 = vmul.f32 %v2232_v38, %v2225_v40  ;;  %v2218_v43 = vmul.f32 %v2372_v30, %v2210_v41 }
0x1226   :  { %v2236_v44 = vsel %vm96_vm3, %v2234_v42, 0.0  ;;  %v2226_v45 = vadd.f32 %v2373_v35, %v2218_v43 }
0x1227   :  { %2237 = vadd.xlane.f32.xlu1 %v2236_v44 }
0x1228   :  { %v2235_v11 = vmul.f32 %v2232_v38, %v2226_v45 }
0x122a   :  { %v2239_v46 = vsel %vm96_vm3, %v2235_v11, 0.0 }
0x122b   :  { %2240 = vadd.xlane.f32.xlu0 %v2239_v46 }
0x12b0   :  { %v2238_v50 = vpop.xlane.xlu1 %2237 }
0x12b1   :  { %v2249_v52 = vsel %vm2247_vm7, %v2238_v50, 0.0 }
0x12b4   :  { %v2241_v51 = vpop.xlane.xlu0 %2240 }
0x12b5   :  { %v2250_v1 = vsel %vm2248_vm8, %v2241_v51, 0.0 }
0x12b6   :  { %v2251_v53 = vadd.f32 %v2250_v1, %v2249_v52 }
0x12b8   :  { %v2252_v54 = vrot.slane %v2251_v53, 4 }
0x12ba   :  { %v2253_v24 = vadd.f32 %v2252_v54, %v2251_v53 }
0x12bc   :  { %v2254_v55 = vrot.slane %v2253_v24, 2 }
0x12be   :  { %v2255_v56 = vadd.f32 %v2254_v55, %v2253_v24 }
0x12c0   :  { %v2256_v57 = vrot.slane %v2255_v56, 1 }
0x12c2   :  { %v2257_v58 = vadd.f32 %v2256_v57, %v2255_v56 }
0x12c4   :  { %v2258_v59 = vadd.f32 %v2257_v58, %v2227_v31 }
0x12c6   :  { %v2263_v60 = vrot.slane %v2258_v59, %v2231_v28 }
0x12c8   :  { %2264 = vrot.lane.b32.xlu1 %v2263_v60, %s2928_s18 }
0x133a   :  { %v2265_v61 = vpop.permute.xlu1 %2264 }
0x133b   :  { %2268 = vst.msk [vmem:[#allocation9] sm:$0x1] %vm2267_vm9, %v2265_v61 }
0x133c   :  { %2900 = shalt.err (!%p2897_p0)
}
0x133d   :  { %2278 = dma.vmem_to_hbm [thread:$0]  %s2276_s20, 16, %s3245_s5, [#allocation6]  }
0x133e   :  { %2913 = dma.done.wait [#allocation6], 16  }
0x133f   :  { %2914 = vsyncadd [#allocation6], 4294967280 }
0x1340   :  { %2282 = vsyncpa [#allocation5], 1 }
0x1341   :  { %2283 = vsyncpa [#allocation8], 1 }
0x1342   :  { %2284 = vsyncpa [#allocation6], 1 }

</bundles_post_ra>
